<compile_context>
chip_gen: v5e
topology: v5e:2x2
jax: 0.10.0
libtpu: 0.0.40
codegen_flags: <defaults>
</compile_context>

<pallas_src>
import functools

import jax
import jax.numpy as jnp
from jax import lax
from jax.experimental import pallas as pl
from jax.experimental.pallas import tpu as pltpu

_LANE = 128


def _round_up(x, m):
    return (x + m - 1) // m * m


def _num_tensorcores():
    """Best-effort TensorCore count of the default device (2 on v7x, else 1)."""
    try:
        kind = (jax.devices()[0].device_kind or "").lower()
        return 2 if ("v7" in kind or "7x" in kind) else 1
    except Exception:
        return 1


def _fused_gated_mlp_kernel(n_hidden, x_ref, *refs):
    """Fused gated-MLP for one tile of nodes.

    refs = [w0, b0, ..., w_{n_hidden-1}, b_{n_hidden-1},
            w_last_layers_T, b_last_layers, w_last_gates_T, b_last_gates, out_ref]
    Hidden w_i are branch-fused (concat / block-diagonal) in compute dtype (bf16);
    biases are f32.  The last layer is computed transposed so the output block is
    (num_targets, tile) -- fully lane-dense.
    """
    out_ref = refs[-1]
    params = refs[:-1]

    h = x_ref[...]                                       # (tile, F), bf16
    for i in range(n_hidden):
        w = params[2 * i][...]                           # (in, out) fused, bf16
        b = params[2 * i + 1][...]                       # (1, out), f32
        h = jnp.dot(h, w, preferred_element_type=jnp.float32) + b
        h = h * jax.nn.sigmoid(h)                        # SiLU on both fused halves (f32)
        h = h.astype(w.dtype)                            # back to bf16 for the next MXU pass

    w_lt = params[2 * n_hidden][...]                     # (nt, 2H), bf16 (zero-padded)
    b_l = params[2 * n_hidden + 1][...]                  # (nt, 1), f32
    w_gt = params[2 * n_hidden + 2][...]                 # (nt, 2H), bf16 (zero-padded)
    b_g = params[2 * n_hidden + 3][...]                  # (nt, 1), f32

    # NT matmul (contract minor dims of both operands): (nt, 2H) x (tile, 2H) -> (nt, tile).
    # Result has nodes on lanes -> dense vst / dense output DMA.
    nt_dims = (((1,), (1,)), ((), ()))
    left_t = lax.dot_general(w_lt, h, nt_dims, preferred_element_type=jnp.float32) + b_l
    gate_t = lax.dot_general(w_gt, h, nt_dims, preferred_element_type=jnp.float32) + b_g
    out_ref[...] = (left_t * jax.nn.sigmoid(gate_t)).astype(out_ref.dtype)


def _build_fused_params(layer_ws, layer_bs, gate_ws, gate_bs, *, compute_dtype):
    """Fuse the layers/gates branches.

    Hidden layers: first layer column-concat (shares x), later layers block-diagonal.
    Last layer: kept as two branch weights, pre-transposed and zero-padded so each
    branch's NT dot consumes the full fused hidden state.
    """
    n_layers = len(layer_ws)
    ws, bs = [], []
    for i in range(n_layers - 1):
        wl, wg = layer_ws[i], gate_ws[i]
        bl, bg = layer_bs[i], gate_bs[i]
        if i == 0:
            w = jnp.concatenate([wl, wg], axis=1)
        else:
            top = jnp.concatenate(
                [wl, jnp.zeros((wl.shape[0], wg.shape[1]), wl.dtype)], axis=1)
            bot = jnp.concatenate(
                [jnp.zeros((wg.shape[0], wl.shape[1]), wg.dtype), wg], axis=1)
            w = jnp.concatenate([top, bot], axis=0)
        ws.append(w.astype(compute_dtype))
        bs.append(jnp.concatenate([bl, bg]).reshape(1, -1).astype(jnp.float32))

    wl, wg = layer_ws[-1], gate_ws[-1]
    bl, bg = layer_bs[-1], gate_bs[-1]
    h_dim, nt = wl.shape
    if n_layers == 1:
        w_lt, w_gt = wl.T, wg.T                         # (nt, F)
    else:
        w_lt = jnp.concatenate([wl.T, jnp.zeros((nt, h_dim), wl.dtype)], axis=1)
        w_gt = jnp.concatenate([jnp.zeros((nt, h_dim), wg.dtype), wg.T], axis=1)
    last = (w_lt.astype(compute_dtype), bl.reshape(-1, 1).astype(jnp.float32),
            w_gt.astype(compute_dtype), bg.reshape(-1, 1).astype(jnp.float32))
    return ws, bs, last


def weighted_readout_pyg(node_feat, layer_ws, layer_bs, gate_ws, gate_bs, *,
                         tile_n=4096, compute_dtype=jnp.bfloat16):
    """Per-node atomic properties: GatedMLP(node_feat) -> (N, num_targets), f32."""
    N, F = node_feat.shape
    n_layers = len(layer_ws)
    n_hidden = n_layers - 1
    num_targets = layer_ws[-1].shape[1]
    n_tc = _num_tensorcores()

    # --- step/tile selection: derive the step count first, then size the tile as
    # cdiv(N, steps) rounded to 128 lanes so padding waste stays small.  On v7x
    # (2 TensorCores) force >=2 steps and an even step count for balance; on
    # v5e/v6e keep the full tile (single TC).
    steps = max(1, pl.cdiv(N, max(int(tile_n), 1)))
    if n_tc >= 2:
        if steps == 1 and N > _LANE:
            steps = 2
        if steps > 1 and steps % 2 == 1:
            steps += 1
    tile = _round_up(max(pl.cdiv(N, steps), 1), _LANE)
    n_pad = steps * tile

    # bf16 activations/weights feed the MXU on every generation (f32 x f32 would
    # lower to multiple bf16 MXU passes); all VPU/EUP math stays f32.  In a full
    # model the producer of node_feat would emit bf16 directly and this cast fuses.
    x = node_feat.astype(compute_dtype)
    if n_pad != N:
        # Zero padding -> finite (bias-derived) outputs on padded rows, sliced off
        # below.  Do NOT switch to NaN/Inf padding or reduce over padded rows.
        x = jnp.pad(x, ((0, n_pad - N), (0, 0)))

    ws, bs, last = _build_fused_params(layer_ws, layer_bs, gate_ws, gate_bs,
                                       compute_dtype=compute_dtype)
    params = []
    for w, b in zip(ws, bs):
        params += [w, b]
    params += list(last)

    # Params are tiny and constant across the grid (index_map always (0,0)) so they
    # stay resident; no per-step re-DMA.
    # TODO(synk): pack them into one lane-padded VMEM buffer with static slices to
    # drop the per-input double-buffer/descriptor bookkeeping entirely.
    param_specs = [pl.BlockSpec(p.shape, lambda i: (0, 0)) for p in params]

    # TODO(synk): if a profile shows exposed DMA on the x stream, add
    # pipeline_mode=pl.Buffered(3) here and sweep.
    x_spec = pl.BlockSpec((tile, F), lambda i: (i, 0))
    # Lane-dense output: targets on sublanes, nodes on lanes -> unmasked stores.
    out_spec = pl.BlockSpec((num_targets, tile), lambda i: (0, i))

    kernel = functools.partial(_fused_gated_mlp_kernel, n_hidden)
    out_t = pl.pallas_call(
        kernel,
        out_shape=jax.ShapeDtypeStruct((num_targets, n_pad), jnp.float32),
        grid=(steps,),
        in_specs=[x_spec] + param_specs,
        out_specs=out_spec,
        compiler_params=pltpu.CompilerParams(
            dimension_semantics=("parallel",),
            # Ample headroom on all generations (v7x physical VMEM is 64 MiB);
            # per-step usage at tile=4096 is ~2-3 MiB.
            vmem_limit_bytes=32 * 1024 * 1024,
        ),
    )(x, *params)

    # (num_targets, n_pad) -> (N, num_targets), always f32 (matches PyTorch module).
    return out_t[:, :N].T


def _reference(node_feat, layer_ws, layer_bs, gate_ws, gate_bs):
    """Pure-JAX f32 reference of GatedMLP forward (activate_last=False)."""
    x = node_feat.astype(jnp.float32)
    h = x
    for i, (w, b) in enumerate(zip(layer_ws, layer_bs)):
        h = h @ w + b
        if i < len(layer_ws) - 1:
            h = jax.nn.silu(h)
    g = x
    for i, (w, b) in enumerate(zip(gate_ws, gate_bs)):
        g = g @ w + b
        g = jax.nn.silu(g) if i < len(gate_ws) - 1 else jax.nn.sigmoid(g)
    return h * g


if __name__ == "__main__":
    # Module hyperparameters (small, consistent with the constructor):
    in_feats = 32
    hidden_dims = [32, 32]          # `dims` arg of WeightedReadOutPYG
    num_targets = 8
    # GatedMLP inside WeightedReadOutPYG sees dims=[in_feats, *dims, num_targets],
    # i.e. its per-layer output widths (first linear maps in_feats -> in_feats).
    gated_dims = [in_feats, *hidden_dims, num_targets]

    num_nodes = 128

    key = jax.random.PRNGKey(0)
    k_x, k_p = jax.random.split(key)
    node_feat = jax.random.normal(k_x, (num_nodes, in_feats), dtype=jnp.float32)

    # Deterministic parameter init (shapes follow nn.Linear chains in GatedMLP).
    layer_ws, layer_bs, gate_ws, gate_bs = [], [], [], []
    fan_in = in_feats
    for out_dim in gated_dims:
        k_p, k1, k2, k3, k4 = jax.random.split(k_p, 5)
        scale = 1.0 / jnp.sqrt(jnp.float32(fan_in))
        layer_ws.append(jax.random.normal(k1, (fan_in, out_dim), jnp.float32) * scale)
        layer_bs.append(jax.random.normal(k2, (out_dim,), jnp.float32) * 0.01)
        gate_ws.append(jax.random.normal(k3, (fan_in, out_dim), jnp.float32) * scale)
        gate_bs.append(jax.random.normal(k4, (out_dim,), jnp.float32) * 0.01)
        fan_in = out_dim

    out = weighted_readout_pyg(node_feat, layer_ws, layer_bs, gate_ws, gate_bs)
    out = jax.block_until_ready(out)

    ref = _reference(node_feat, layer_ws, layer_bs, gate_ws, gate_bs)
    assert out.shape == (num_nodes, num_targets)
    assert out.dtype == jnp.float32
    # bf16 MXU operands (f32 accumulation) -> loosened tolerance vs. the f32 reference.
    assert jnp.allclose(out, ref, atol=5e-2, rtol=5e-2), (
        float(jnp.max(jnp.abs(out - ref))))

    print("KERNEL_OK")
</pallas_src>

<mosaic_0001>
module attributes {stable_mosaic.version = 11 : i64} {
  func.func @_fused_gated_mlp_kernel(%arg0: i32, %arg1: memref<128x32xbf16, #tpu.memory_space<vmem>>, %arg2: memref<32x64xbf16, #tpu.memory_space<vmem>>, %arg3: memref<1x64xf32, #tpu.memory_space<vmem>>, %arg4: memref<64x64xbf16, #tpu.memory_space<vmem>>, %arg5: memref<1x64xf32, #tpu.memory_space<vmem>>, %arg6: memref<64x64xbf16, #tpu.memory_space<vmem>>, %arg7: memref<1x64xf32, #tpu.memory_space<vmem>>, %arg8: memref<8x64xbf16, #tpu.memory_space<vmem>>, %arg9: memref<8x1xf32, #tpu.memory_space<vmem>>, %arg10: memref<8x64xbf16, #tpu.memory_space<vmem>>, %arg11: memref<8x1xf32, #tpu.memory_space<vmem>>, %arg12: memref<8x128xf32, #tpu.memory_space<vmem>>) attributes {dimension_semantics = [#tpu.dimension_semantics<parallel>], iteration_bounds = array<i64: 1>, scalar_prefetch = 0 : i64, scratch_operands = 0 : i64, tpu.core_type = #tpu.core_type<tc>, window_params = [{transform_indices = @transform_0, window_bounds = array<i64: 128, 32>}, {pipeline_mode = #tpu.pipeline_mode<synchronous>, transform_indices = @transform_1, window_bounds = array<i64: 32, 64>}, {pipeline_mode = #tpu.pipeline_mode<synchronous>, transform_indices = @transform_2, window_bounds = array<i64: 1, 64>}, {pipeline_mode = #tpu.pipeline_mode<synchronous>, transform_indices = @transform_3, window_bounds = array<i64: 64, 64>}, {pipeline_mode = #tpu.pipeline_mode<synchronous>, transform_indices = @transform_4, window_bounds = array<i64: 1, 64>}, {pipeline_mode = #tpu.pipeline_mode<synchronous>, transform_indices = @transform_5, window_bounds = array<i64: 64, 64>}, {pipeline_mode = #tpu.pipeline_mode<synchronous>, transform_indices = @transform_6, window_bounds = array<i64: 1, 64>}, {pipeline_mode = #tpu.pipeline_mode<synchronous>, transform_indices = @transform_7, window_bounds = array<i64: 8, 64>}, {pipeline_mode = #tpu.pipeline_mode<synchronous>, transform_indices = @transform_8, window_bounds = array<i64: 8, 1>}, {pipeline_mode = #tpu.pipeline_mode<synchronous>, transform_indices = @transform_9, window_bounds = array<i64: 8, 64>}, {pipeline_mode = #tpu.pipeline_mode<synchronous>, transform_indices = @transform_10, window_bounds = array<i64: 8, 1>}, {transform_indices = @transform_11, window_bounds = array<i64: 8, 128>}]} {
    %c0 = arith.constant 0 : index
    %c0_0 = arith.constant 0 : index
    %0 = vector.load %arg1[%c0, %c0_0] : memref<128x32xbf16, #tpu.memory_space<vmem>>, vector<128x32xbf16>
    %c0_1 = arith.constant 0 : index
    %c0_2 = arith.constant 0 : index
    %1 = vector.load %arg2[%c0_1, %c0_2] : memref<32x64xbf16, #tpu.memory_space<vmem>>, vector<32x64xbf16>
    %c0_3 = arith.constant 0 : index
    %c0_4 = arith.constant 0 : index
    %2 = vector.load %arg3[%c0_3, %c0_4] : memref<1x64xf32, #tpu.memory_space<vmem>>, vector<1x64xf32>
    %cst = arith.constant dense<0.000000e+00> : vector<128x64xf32>
    %3 = tpu.matmul %0, %1, %cst {dimension_numbers = #tpu.dot_dimension_numbers<[1], [0], [0], [1], [0, 0, 1, 1], [], []>} : vector<128x32xbf16>, vector<32x64xbf16>, vector<128x64xf32> -> vector<128x64xf32>
    %4 = vector.broadcast %2 : vector<1x64xf32> to vector<128x64xf32>
    %5 = arith.addf %3, %4 : vector<128x64xf32>
    %6 = arith.negf %5 : vector<128x64xf32>
    %7 = math.exp %6 : vector<128x64xf32>
    %cst_5 = arith.constant 1.000000e+00 : f32
    %8 = vector.broadcast %cst_5 : f32 to vector<128x64xf32>
    %9 = arith.addf %8, %7 : vector<128x64xf32>
    %10 = arith.divf %8, %9 : vector<128x64xf32>
    %11 = arith.mulf %5, %10 : vector<128x64xf32>
    %12 = arith.truncf %11 : vector<128x64xf32> to vector<128x64xbf16>
    %c0_6 = arith.constant 0 : index
    %c0_7 = arith.constant 0 : index
    %13 = vector.load %arg4[%c0_6, %c0_7] : memref<64x64xbf16, #tpu.memory_space<vmem>>, vector<64x64xbf16>
    %c0_8 = arith.constant 0 : index
    %c0_9 = arith.constant 0 : index
    %14 = vector.load %arg5[%c0_8, %c0_9] : memref<1x64xf32, #tpu.memory_space<vmem>>, vector<1x64xf32>
    %cst_10 = arith.constant dense<0.000000e+00> : vector<128x64xf32>
    %15 = tpu.matmul %12, %13, %cst_10 {dimension_numbers = #tpu.dot_dimension_numbers<[1], [0], [0], [1], [0, 0, 1, 1], [], []>} : vector<128x64xbf16>, vector<64x64xbf16>, vector<128x64xf32> -> vector<128x64xf32>
    %16 = vector.broadcast %14 : vector<1x64xf32> to vector<128x64xf32>
    %17 = arith.addf %15, %16 : vector<128x64xf32>
    %18 = arith.negf %17 : vector<128x64xf32>
    %19 = math.exp %18 : vector<128x64xf32>
    %cst_11 = arith.constant 1.000000e+00 : f32
    %20 = vector.broadcast %cst_11 : f32 to vector<128x64xf32>
    %21 = arith.addf %20, %19 : vector<128x64xf32>
    %22 = arith.divf %20, %21 : vector<128x64xf32>
    %23 = arith.mulf %17, %22 : vector<128x64xf32>
    %24 = arith.truncf %23 : vector<128x64xf32> to vector<128x64xbf16>
    %c0_12 = arith.constant 0 : index
    %c0_13 = arith.constant 0 : index
    %25 = vector.load %arg6[%c0_12, %c0_13] : memref<64x64xbf16, #tpu.memory_space<vmem>>, vector<64x64xbf16>
    %c0_14 = arith.constant 0 : index
    %c0_15 = arith.constant 0 : index
    %26 = vector.load %arg7[%c0_14, %c0_15] : memref<1x64xf32, #tpu.memory_space<vmem>>, vector<1x64xf32>
    %cst_16 = arith.constant dense<0.000000e+00> : vector<128x64xf32>
    %27 = tpu.matmul %24, %25, %cst_16 {dimension_numbers = #tpu.dot_dimension_numbers<[1], [0], [0], [1], [0, 0, 1, 1], [], []>} : vector<128x64xbf16>, vector<64x64xbf16>, vector<128x64xf32> -> vector<128x64xf32>
    %28 = vector.broadcast %26 : vector<1x64xf32> to vector<128x64xf32>
    %29 = arith.addf %27, %28 : vector<128x64xf32>
    %30 = arith.negf %29 : vector<128x64xf32>
    %31 = math.exp %30 : vector<128x64xf32>
    %cst_17 = arith.constant 1.000000e+00 : f32
    %32 = vector.broadcast %cst_17 : f32 to vector<128x64xf32>
    %33 = arith.addf %32, %31 : vector<128x64xf32>
    %34 = arith.divf %32, %33 : vector<128x64xf32>
    %35 = arith.mulf %29, %34 : vector<128x64xf32>
    %36 = arith.truncf %35 : vector<128x64xf32> to vector<128x64xbf16>
    %c0_18 = arith.constant 0 : index
    %c0_19 = arith.constant 0 : index
    %37 = vector.load %arg8[%c0_18, %c0_19] : memref<8x64xbf16, #tpu.memory_space<vmem>>, vector<8x64xbf16>
    %c0_20 = arith.constant 0 : index
    %c0_21 = arith.constant 0 : index
    %38 = vector.load %arg9[%c0_20, %c0_21] : memref<8x1xf32, #tpu.memory_space<vmem>>, vector<8x1xf32>
    %c0_22 = arith.constant 0 : index
    %c0_23 = arith.constant 0 : index
    %39 = vector.load %arg10[%c0_22, %c0_23] : memref<8x64xbf16, #tpu.memory_space<vmem>>, vector<8x64xbf16>
    %c0_24 = arith.constant 0 : index
    %c0_25 = arith.constant 0 : index
    %40 = vector.load %arg11[%c0_24, %c0_25] : memref<8x1xf32, #tpu.memory_space<vmem>>, vector<8x1xf32>
    %cst_26 = arith.constant dense<0.000000e+00> : vector<8x128xf32>
    %41 = tpu.matmul %37, %36, %cst_26 {dimension_numbers = #tpu.dot_dimension_numbers<[1], [1], [0], [0], [0, 0, 1, 0], [], []>} : vector<8x64xbf16>, vector<128x64xbf16>, vector<8x128xf32> -> vector<8x128xf32>
    %42 = vector.broadcast %38 : vector<8x1xf32> to vector<8x128xf32>
    %43 = arith.addf %41, %42 : vector<8x128xf32>
    %cst_27 = arith.constant dense<0.000000e+00> : vector<8x128xf32>
    %44 = tpu.matmul %39, %36, %cst_27 {dimension_numbers = #tpu.dot_dimension_numbers<[1], [1], [0], [0], [0, 0, 1, 0], [], []>} : vector<8x64xbf16>, vector<128x64xbf16>, vector<8x128xf32> -> vector<8x128xf32>
    %45 = vector.broadcast %40 : vector<8x1xf32> to vector<8x128xf32>
    %46 = arith.addf %44, %45 : vector<8x128xf32>
    %47 = arith.negf %46 : vector<8x128xf32>
    %48 = math.exp %47 : vector<8x128xf32>
    %cst_28 = arith.constant 1.000000e+00 : f32
    %49 = vector.broadcast %cst_28 : f32 to vector<8x128xf32>
    %50 = arith.addf %49, %48 : vector<8x128xf32>
    %51 = arith.divf %49, %50 : vector<8x128xf32>
    %52 = arith.mulf %43, %51 : vector<8x128xf32>
    %c0_29 = arith.constant 0 : index
    %c0_30 = arith.constant 0 : index
    %53 = vector.load %arg12[%c0_29, %c0_30] : memref<8x128xf32, #tpu.memory_space<vmem>>, vector<8x128xf32>
    tpu.vector_store %arg12[%c0_29, %c0_30], %52 {strides = array<i32>} : memref<8x128xf32, #tpu.memory_space<vmem>>, vector<8x128xf32>,
    return
  }
  func.func @transform_0(%arg0: i32) -> (i32, i32) {
    %c0_i32 = arith.constant 0 : i32
    %c0_i32_0 = arith.constant 0 : i32
    return %arg0, %c0_i32 : i32, i32
  }
  func.func @transform_1(%arg0: i32) -> (i32, i32) {
    %c0_i32 = arith.constant 0 : i32
    %c0_i32_0 = arith.constant 0 : i32
    %c0_i32_1 = arith.constant 0 : i32
    return %c0_i32, %c0_i32_0 : i32, i32
  }
  func.func @transform_2(%arg0: i32) -> (i32, i32) {
    %c0_i32 = arith.constant 0 : i32
    %c0_i32_0 = arith.constant 0 : i32
    %c0_i32_1 = arith.constant 0 : i32
    return %c0_i32, %c0_i32_0 : i32, i32
  }
  func.func @transform_3(%arg0: i32) -> (i32, i32) {
    %c0_i32 = arith.constant 0 : i32
    %c0_i32_0 = arith.constant 0 : i32
    %c0_i32_1 = arith.constant 0 : i32
    return %c0_i32, %c0_i32_0 : i32, i32
  }
  func.func @transform_4(%arg0: i32) -> (i32, i32) {
    %c0_i32 = arith.constant 0 : i32
    %c0_i32_0 = arith.constant 0 : i32
    %c0_i32_1 = arith.constant 0 : i32
    return %c0_i32, %c0_i32_0 : i32, i32
  }
  func.func @transform_5(%arg0: i32) -> (i32, i32) {
    %c0_i32 = arith.constant 0 : i32
    %c0_i32_0 = arith.constant 0 : i32
    %c0_i32_1 = arith.constant 0 : i32
    return %c0_i32, %c0_i32_0 : i32, i32
  }
  func.func @transform_6(%arg0: i32) -> (i32, i32) {
    %c0_i32 = arith.constant 0 : i32
    %c0_i32_0 = arith.constant 0 : i32
    %c0_i32_1 = arith.constant 0 : i32
    return %c0_i32, %c0_i32_0 : i32, i32
  }
  func.func @transform_7(%arg0: i32) -> (i32, i32) {
    %c0_i32 = arith.constant 0 : i32
    %c0_i32_0 = arith.constant 0 : i32
    %c0_i32_1 = arith.constant 0 : i32
    return %c0_i32, %c0_i32_0 : i32, i32
  }
  func.func @transform_8(%arg0: i32) -> (i32, i32) {
    %c0_i32 = arith.constant 0 : i32
    %c0_i32_0 = arith.constant 0 : i32
    %c0_i32_1 = arith.constant 0 : i32
    return %c0_i32, %c0_i32_0 : i32, i32
  }
  func.func @transform_9(%arg0: i32) -> (i32, i32) {
    %c0_i32 = arith.constant 0 : i32
    %c0_i32_0 = arith.constant 0 : i32
    %c0_i32_1 = arith.constant 0 : i32
    return %c0_i32, %c0_i32_0 : i32, i32
  }
  func.func @transform_10(%arg0: i32) -> (i32, i32) {
    %c0_i32 = arith.constant 0 : i32
    %c0_i32_0 = arith.constant 0 : i32
    %c0_i32_1 = arith.constant 0 : i32
    return %c0_i32, %c0_i32_0 : i32, i32
  }
  func.func @transform_11(%arg0: i32) -> (i32, i32) {
    %c0_i32 = arith.constant 0 : i32
    %c0_i32_0 = arith.constant 0 : i32
    return %c0_i32, %arg0 : i32, i32
  }
}

</mosaic_0001>

<bundles_post_ra>
// kernel: tpu_custom_call.1
= control target key start
LH: loop header
LB: loop body
LE: loop exit
PB: predicated region body
PF: predicated region fallthrough
CT: control target
= control target key end

     0   :  { %16 = vsyncpa [#allocation3], 0  ;;  %s2734_s0 = inlined_call_operand.vmem [shape: bf16[128,32], index: 0, kind: input, shape index: {}]   ;;  %s2735_s1 = inlined_call_operand.vmem [shape: bf16[32,64], index: 1, kind: input, shape index: {}]   ;;  %s2736_s2 = inlined_call_operand.vmem [shape: f32[1,64], index: 2, kind: input, shape index: {}]   ;;  %s2737_s3 = inlined_call_operand.vmem [shape: bf16[64,64], index: 3, kind: input, shape index: {}]   ;;  %s2738_s4 = inlined_call_operand.hbm [shape: f32[1,64], index: 4, kind: input, shape index: {}]   ;;  %s2739_s5 = inlined_call_operand.vmem [shape: bf16[64,64], index: 5, kind: input, shape index: {}]   ;;  %s2740_s6 = inlined_call_operand.hbm [shape: f32[1,64], index: 6, kind: input, shape index: {}]   ;;  %s2741_s7 = inlined_call_operand.vmem [shape: bf16[8,64], index: 7, kind: input, shape index: {}]   ;;  %s2742_s8 = inlined_call_operand.vmem [shape: f32[8,1], index: 8, kind: input, shape index: {}]   ;;  %s2743_s9 = inlined_call_operand.hbm [shape: bf16[8,64], index: 9, kind: input, shape index: {}]   ;;  %s2744_s10 = inlined_call_operand.vmem [shape: f32[8,1], index: 10, kind: input, shape index: {}]   ;;  %s2745_s11 = inlined_call_operand.hbm [shape: f32[8,128], index: 11, kind: output, shape index: {}]  }
   0x1   :  { %17 = vsyncpa [#allocation6], 0  ;;  %s45_s19 = sshll.u32 %s2740_s6, 4  ;;  %s46_s19 = int_to_ptr.hbm [resolvable:$true] %s45_s19 }
   0x2   :  { %18 = vsyncpa [#allocation4], 0  ;;  %s2015_s20 = smov [#allocation5]   ;;  %s32_s24 = sshll.u32 %s2738_s4, 4  ;;  %s33_s24 = int_to_ptr.hbm [resolvable:$true] %s32_s24 }
   0x3   :  { %s47_s21 = sshll.u32 %s2015_s20, 4  ;;  %s2016_s25 = smov [#allocation2]   ;;  %s48_s21 = int_to_ptr.vmem [resolvable:$true] %s47_s21 }
   0x4   :  { %50 = dma.hbm_to_vmem [thread:$0]  %s46_s19, 16, %s48_s21, [#allocation6]  }
   0x5   :  { %s34_s26 = sshll.u32 %s2016_s25, 4  ;;  %s60_s29 = sshll.u32 %s2743_s9, 4  ;;  %s35_s26 = int_to_ptr.vmem [resolvable:$true] %s34_s26  ;;  %s61_s29 = int_to_ptr.hbm [resolvable:$true] %s60_s29 }
   0x6   :  { %37 = dma.hbm_to_vmem [thread:$0]  %s33_s24, 16, %s35_s26, [#allocation3]  }
   0x7   :  { %s2017_s6 = smov [#allocation7]  }
   0x8   :  { %s62_s30 = sshll.u32 %s2017_s6, 4  ;;  %s63_s30 = int_to_ptr.vmem [resolvable:$true] %s62_s30 }
   0x9   :  { %65 = dma.hbm_to_vmem [thread:$0]  %s61_s29, 64, %s63_s30, [#allocation6]  }
   0xa   :  { %2009 = dma.done.wait [#allocation3], 16  }
   0xb   :  { %2010 = vsyncadd [#allocation3], 4294967280 }
   0xc   :  { %2011 = dma.done.wait [#allocation6], 80  }
   0xd   :  { %2012 = vsyncadd [#allocation6], 4294967216  ;;  %v1699_v0 = vld [vmem:[%s2735_s1 + $0x8] sm:$0xff]  ;;  %v1698_v1 = vld [vmem:[%s2735_s1] sm:$0xff]  ;;  %vm157_vm0 = vcmask 261120   ;;  %vm595_vm9 = vcmask 523264  }
   0xe   :  { %188 = vmatpush.bf16.msra.mxu0 %v1699_v0  ;;  %v1690_v2 = vld [vmem:[%s2734_s0] sm:$0xff]  ;;  %v1691_v3 = vld [vmem:[%s2734_s0 + $0x8] sm:$0xff]  ;;  %v1692_v4 = vld [vmem:[%s2734_s0 + $0x10] sm:$0xff]  ;;  %s1532_s27 = sshll.u32 %s2745_s11, 4  ;;  %s1533_s27 = int_to_ptr.hbm [resolvable:$true] %s1532_s27 }
   0xf   :  { %v1693_v5 = vld [vmem:[%s2734_s0 + $0x18] sm:$0xff]  ;;  %v1694_v6 = vld [vmem:[%s2734_s0 + $0x20] sm:$0xff]  ;;  %v1695_v7 = vld [vmem:[%s2734_s0 + $0x28] sm:$0xff] }
  0x10   :  { %v1696_v8 = vld [vmem:[%s2734_s0 + $0x30] sm:$0xff]  ;;  %v1697_v9 = vld [vmem:[%s2734_s0 + $0x38] sm:$0xff]  ;;  %v2125_v11 = vld [vmem:[%s2736_s2] ss:$0 sm:$0xff] }
  0x11   :  { %v1703_v10 = vld [vmem:[%s2737_s3 + $0x18] sm:$0xff]  ;;  %v1702_v12 = vld [vmem:[%s2737_s3 + $0x10] sm:$0xff]  ;;  %v1701_v16 = vld [vmem:[%s2737_s3 + $0x8] sm:$0xff] }
  0x12   :  { %189 = vmatpush.bf16.msra.mxu0 %v1698_v1  ;;  %624 = vmatpush.bf16.msra.mxu1 %v1703_v10  ;;  %v1700_v17 = vld [vmem:[%s2737_s3] sm:$0xff] }
  0x15   :  { %1583 = vmatmul.msk.bf16.vlgmr.msra.gmra.mxu0 %vm157_vm0, %v1690_v2 }
  0x16   :  { %625 = vmatpush.bf16.msra.mxu1 %v1702_v12 }
  0x1a   :  { %626 = vmatpush.bf16.msra.mxu1 %v1701_v16 }
  0x1e   :  { %627 = vmatpush.bf16.msra.mxu1 %v1700_v17 }
  0x25   :  { %1584 = vmatmul.msk.bf16.gmra.mxu0 %vm157_vm0, %v1691_v3 }
  0x35   :  { %1585 = vmatmul.msk.bf16.gmra.mxu0 %vm157_vm0, %v1692_v4 }
  0x45   :  { %1586 = vmatmul.msk.bf16.gmra.mxu0 %vm157_vm0, %v1693_v5 }
  0x55   :  { %1587 = vmatmul.msk.bf16.gmra.mxu0 %vm157_vm0, %v1694_v6 }
  0x65   :  { %1588 = vmatmul.msk.bf16.gmra.mxu0 %vm157_vm0, %v1695_v7 }
  0x75   :  { %1589 = vmatmul.msk.bf16.gmra.mxu0 %vm157_vm0, %v1696_v8 }
  0x85   :  { %1590 = vmatmul.msk.bf16.gmra.mxu0 %vm157_vm0, %v1697_v9 }
  0x92   :  { %v191_v13 = vpop.f32.mrf.mxu0 }
  0x93   :  { %v2131_v14 = vadd.f32 %v2125_v11, %v191_v13 }
  0x95   :  { %v1591_v15 = vmul.f32 -1.442695, %v2131_v14 }
  0x97   :  { %1717 = vpow2.f32 %v1591_v15 }
  0x9a   :  { %v193_v18 = vpop.f32.mrf.mxu0 }
  0x9b   :  { %v194_v19 = vadd.f32 %v2125_v11, %v193_v18 }
  0x9d   :  { %v1718_v20 = vpop.eup %1717  ;;  %v1592_v21 = vmul.f32 -1.442695, %v194_v19 }
  0x9e   :  { %v279_v22 = vadd.f32 1.0, %v1718_v20 }
  0x9f   :  { %1719 = vpow2.f32 %v1592_v21 }
  0xa0   :  { %1721 = vrcp.f32 %v279_v22  ;;  %v306_v40 = vand.u32 2147483648, %v279_v22  ;;  %vm300_vm2 = vweird.f32 %v279_v22  ;;  %v304_v41 = vand.u32 2147483647, %v279_v22 }
  0xa2   :  { %v196_v23 = vpop.f32.mrf.mxu0  ;;  %v307_v50 = vor.u32 1.1754944e-38, %v306_v40  ;;  %vm305_vm5 = vcmp.eq.f32.partialorder %v304_v41, 8.507059e+37 }
  0xa3   :  { %v2142_v24 = vadd.f32 %v2125_v11, %v196_v23 }
  0xa5   :  { %v1720_v25 = vpop.eup %1719  ;;  %v1593_v26 = vmul.f32 -1.442695, %v2142_v24 }
  0xa6   :  { %v1722_v27 = vpop.eup %1721  ;;  %v280_v28 = vadd.f32 1.0, %v1720_v25 }
  0xa7   :  { %v296_v29 = vmul.f32 %v1722_v27, %v279_v22  ;;  %1723 = vpow2.f32 %v1593_v26  ;;  %vm301_vm1 = vweird.f32 %v1722_v27 }
  0xa8   :  { %1725 = vrcp.f32 %v280_v28  ;;  %vm2152_vm3 = vmor %vm300_vm2, %vm301_vm1  ;;  %v319_v44 = vand.u32 2147483647, %v280_v28  ;;  %v321_v45 = vand.u32 2147483648, %v280_v28  ;;  %vm315_vm6 = vweird.f32 %v280_v28 }
  0xa9   :  { %v297_v30 = vsub.f32 1.0, %v296_v29 }
  0xaa   :  { %v198_v31 = vpop.f32.mrf.mxu0  ;;  %v322_v56 = vor.u32 1.1754944e-38, %v321_v45  ;;  %vm320_vm8 = vcmp.eq.f32.partialorder %v319_v44, 8.507059e+37 }
  0xab   :  { %v298_v32 = vmul.f32 %v1722_v27, %v297_v30  ;;  %v2146_v33 = vadd.f32 %v2125_v11, %v198_v31 }
  0xad   :  { %v1724_v34 = vpop.eup %1723  ;;  %v1594_v35 = vmul.f32 -1.442695, %v2146_v33  ;;  %v299_v38 = vadd.f32 %v1722_v27, %v298_v32 }
  0xae   :  { %v1726_v36 = vpop.eup %1725  ;;  %v2149_v37 = vadd.f32 1.0, %v1724_v34 }
  0xaf   :  { %v311_v39 = vmul.f32 %v1726_v36, %v280_v28  ;;  %1727 = vpow2.f32 %v1594_v35  ;;  %v303_v47 = vsel %vm2152_vm3, %v1722_v27, %v299_v38  ;;  %vm316_vm4 = vweird.f32 %v1726_v36 }
  0xb0   :  { %1729 = vrcp.f32 %v2149_v37  ;;  %v308_v55 = vsel %vm305_vm5, %v307_v50, %v303_v47  ;;  %vm317_vm7 = vmor %vm315_vm6, %vm316_vm4  ;;  %v336_v10 = vand.u32 2147483648, %v2149_v37  ;;  %vm330_vm11 = vweird.f32 %v2149_v37 }
  0xb1   :  { %v312_v42 = vsub.f32 1.0, %v311_v39  ;;  %v535_v61 = vmul.f32 %v308_v55, %v2131_v14  ;;  %v334_v12 = vand.u32 2147483647, %v2149_v37 }
  0xb2   :  { %v201_v46 = vpop.f32.mrf.mxu0  ;;  %v337_v21 = vor.u32 1.1754944e-38, %v336_v10 }
  0xb3   :  { %v313_v48 = vmul.f32 %v1726_v36, %v312_v42  ;;  %v2159_v49 = vadd.f32 %v2125_v11, %v201_v46  ;;  %vm335_vm14 = vcmp.eq.f32.partialorder %v334_v12, 8.507059e+37 }
  0xb5   :  { %v1728_v51 = vpop.eup %1727  ;;  %v314_v52 = vadd.f32 %v1726_v36, %v313_v48  ;;  %v1595_v53 = vmul.f32 -1.442695, %v2159_v49 }
  0xb6   :  { %v1730_v54 = vpop.eup %1729  ;;  %v282_v57 = vadd.f32 1.0, %v1728_v51 }
  0xb7   :  { %v318_v58 = vsel %vm317_vm7, %v1726_v36, %v314_v52  ;;  %v326_v59 = vmul.f32 %v1730_v54, %v2149_v37  ;;  %1731 = vpow2.f32 %v1595_v53  ;;  %vm331_vm10 = vweird.f32 %v1730_v54 }
  0xb8   :  { %v323_v60 = vsel %vm320_vm8, %v322_v56, %v318_v58  ;;  %1733 = vrcp.f32 %v282_v57  ;;  %vm2175_vm12 = vmor %vm330_vm11, %vm331_vm10  ;;  %v349_v15 = vand.u32 2147483647, %v282_v57  ;;  %v351_v16 = vand.u32 2147483648, %v282_v57 }
  0xb9   :  { %v536_v62 = vmul.f32 %v323_v60, %v194_v19  ;;  %v327_v63 = vsub.f32 1.0, %v326_v59  ;;  %vm345_vm15 = vweird.f32 %v282_v57 }
  0xba   :  { %v203_v0 = vpop.f32.mrf.mxu0  ;;  %v352_v28 = vor.u32 1.1754944e-38, %v351_v16  ;;  %vm350_vm1 = vcmp.eq.f32.partialorder %v349_v15, 8.507059e+37 }
  0xbb   :  { %v328_v1 = vmul.f32 %v1730_v54, %v327_v63  ;;  %v2165_v2 = vadd.f32 %v2125_v11, %v203_v0  ;;  %v551_v3 = vpack.c.bf16 %v536_v62, %v535_v61 }
  0xbd   :  { %v1732_v4 = vpop.eup %1731  ;;  %v1596_v5 = vmul.f32 -1.442695, %v2165_v2  ;;  %1623 = vmatmul.msk.bf16.vlgmr.msra.gmra.mxu1 %vm595_vm9, %v551_v3  ;;  %v329_v8 = vadd.f32 %v1730_v54, %v328_v1 }
  0xbe   :  { %v1734_v6 = vpop.eup %1733  ;;  %v2169_v7 = vadd.f32 1.0, %v1732_v4 }
  0xbf   :  { %v341_v9 = vmul.f32 %v1734_v6, %v282_v57  ;;  %1735 = vpow2.f32 %v1596_v5  ;;  %v333_v18 = vsel %vm2175_vm12, %v1730_v54, %v329_v8  ;;  %vm346_vm13 = vweird.f32 %v1734_v6 }
  0xc0   :  { %1737 = vrcp.f32 %v2169_v7  ;;  %v338_v27 = vsel %vm335_vm14, %v337_v21, %v333_v18  ;;  %vm347_vm0 = vmor %vm345_vm15, %vm346_vm13  ;;  %vm360_vm3 = vweird.f32 %v2169_v7  ;;  %v364_v46 = vand.u32 2147483647, %v2169_v7 }
  0xc1   :  { %v342_v13 = vsub.f32 1.0, %v341_v9  ;;  %v537_v34 = vmul.f32 %v338_v27, %v2142_v24 }
  0xc2   :  { %v206_v17 = vpop.f32.mrf.mxu0  ;;  %vm365_vm6 = vcmp.eq.f32.partialorder %v364_v46, 8.507059e+37 }
  0xc3   :  { %v343_v19 = vmul.f32 %v1734_v6, %v342_v13  ;;  %v2182_v20 = vadd.f32 %v2125_v11, %v206_v17 }
  0xc5   :  { %v1736_v22 = vpop.eup %1735  ;;  %v344_v23 = vadd.f32 %v1734_v6, %v343_v19  ;;  %v1597_v25 = vmul.f32 -1.442695, %v2182_v20 }
  0xc6   :  { %v1738_v26 = vpop.eup %1737  ;;  %v284_v29 = vadd.f32 1.0, %v1736_v22 }
  0xc7   :  { %v348_v30 = vsel %vm347_vm0, %v1734_v6, %v344_v23  ;;  %v356_v31 = vmul.f32 %v1738_v26, %v2169_v7  ;;  %1739 = vpow2.f32 %v1597_v25  ;;  %vm361_vm2 = vweird.f32 %v1738_v26 }
  0xc8   :  { %v353_v32 = vsel %vm350_vm1, %v352_v28, %v348_v30  ;;  %1741 = vrcp.f32 %v284_v29  ;;  %vm2199_vm4 = vmor %vm360_vm3, %vm361_vm2  ;;  %v379_v50 = vand.u32 2147483647, %v284_v29  ;;  %v381_v51 = vand.u32 2147483648, %v284_v29 }
  0xc9   :  { %v538_v35 = vmul.f32 %v353_v32, %v2146_v33  ;;  %v357_v36 = vsub.f32 1.0, %v356_v31  ;;  %v366_v33 = vand.u32 2147483648, %v2169_v7  ;;  %vm375_vm7 = vweird.f32 %v284_v29 }
  0xca   :  { %v208_v37 = vpop.f32.mrf.mxu0  ;;  %v382_v62 = vor.u32 1.1754944e-38, %v381_v51  ;;  %vm380_vm10 = vcmp.eq.f32.partialorder %v379_v50, 8.507059e+37 }
  0xcb   :  { %v358_v38 = vmul.f32 %v1738_v26, %v357_v36  ;;  %v2189_v39 = vadd.f32 %v2125_v11, %v208_v37  ;;  %v552_v40 = vpack.c.bf16 %v538_v35, %v537_v34  ;;  %v367_v56 = vor.u32 1.1754944e-38, %v366_v33 }
  0xcd   :  { %v1740_v41 = vpop.eup %1739  ;;  %v1598_v42 = vmul.f32 -1.442695, %v2189_v39  ;;  %1624 = vmatmul.msk.bf16.gmra.mxu1 %vm595_vm9, %v552_v40  ;;  %v359_v45 = vadd.f32 %v1738_v26, %v358_v38 }
  0xce   :  { %v1742_v43 = vpop.eup %1741  ;;  %v2193_v44 = vadd.f32 1.0, %v1740_v41 }
  0xcf   :  { %v371_v24 = vmul.f32 %v1742_v43, %v284_v29  ;;  %1743 = vpow2.f32 %v1598_v42  ;;  %v363_v53 = vsel %vm2199_vm4, %v1738_v26, %v359_v45  ;;  %vm376_vm5 = vweird.f32 %v1742_v43 }
  0xd0   :  { %1745 = vrcp.f32 %v2193_v44  ;;  %v368_v61 = vsel %vm365_vm6, %v367_v56, %v363_v53  ;;  %vm377_vm8 = vmor %vm375_vm7, %vm376_vm5  ;;  %vm390_vm12 = vweird.f32 %v2193_v44  ;;  %v394_v17 = vand.u32 2147483647, %v2193_v44 }
  0xd1   :  { %v372_v47 = vsub.f32 1.0, %v371_v24  ;;  %v539_v4 = vmul.f32 %v368_v61, %v2159_v49 }
  0xd2   :  { %v211_v52 = vpop.f32.mrf.mxu0  ;;  %vm395_vm15 = vcmp.eq.f32.partialorder %v394_v17, 8.507059e+37 }
  0xd3   :  { %v373_v54 = vmul.f32 %v1742_v43, %v372_v47  ;;  %v2206_v55 = vadd.f32 %v2125_v11, %v211_v52 }
  0xd5   :  { %v1744_v57 = vpop.eup %1743  ;;  %v374_v58 = vadd.f32 %v1742_v43, %v373_v54  ;;  %v1599_v59 = vmul.f32 -1.442695, %v2206_v55 }
  0xd6   :  { %v1746_v60 = vpop.eup %1745  ;;  %v286_v63 = vadd.f32 1.0, %v1744_v57 }
  0xd7   :  { %v378_v0 = vsel %vm377_vm8, %v1742_v43, %v374_v58  ;;  %v386_v1 = vmul.f32 %v1746_v60, %v2193_v44  ;;  %1747 = vpow2.f32 %v1599_v59  ;;  %vm391_vm11 = vweird.f32 %v1746_v60 }
  0xd8   :  { %v383_v3 = vsel %vm380_vm10, %v382_v62, %v378_v0  ;;  %1749 = vrcp.f32 %v286_v63  ;;  %vm2223_vm13 = vmor %vm390_vm12, %vm391_vm11  ;;  %v409_v21 = vand.u32 2147483647, %v286_v63  ;;  %v411_v22 = vand.u32 2147483648, %v286_v63 }
  0xd9   :  { %v540_v5 = vmul.f32 %v383_v3, %v2165_v2  ;;  %v387_v6 = vsub.f32 1.0, %v386_v1  ;;  %v396_v2 = vand.u32 2147483648, %v2193_v44  ;;  %vm405_vm0 = vweird.f32 %v286_v63 }
  0xda   :  { %v213_v7 = vpop.f32.mrf.mxu0  ;;  %v412_v35 = vor.u32 1.1754944e-38, %v411_v22  ;;  %vm410_vm2 = vcmp.eq.f32.partialorder %v409_v21, 8.507059e+37 }
  0xdb   :  { %v388_v8 = vmul.f32 %v1746_v60, %v387_v6  ;;  %v2213_v9 = vadd.f32 %v2125_v11, %v213_v7  ;;  %v553_v10 = vpack.c.bf16 %v540_v5, %v539_v4  ;;  %v397_v28 = vor.u32 1.1754944e-38, %v396_v2 }
  0xdd   :  { %v1748_v12 = vpop.eup %1747  ;;  %v1600_v13 = vmul.f32 -1.442695, %v2213_v9  ;;  %1625 = vmatmul.msk.bf16.gmra.mxu1 %vm595_vm9, %v553_v10  ;;  %v389_v16 = vadd.f32 %v1746_v60, %v388_v8 }
  0xde   :  { %v1750_v14 = vpop.eup %1749  ;;  %v2217_v15 = vadd.f32 1.0, %v1748_v12 }
  0xdf   :  { %v401_v49 = vmul.f32 %v1750_v14, %v286_v63  ;;  %1751 = vpow2.f32 %v1600_v13  ;;  %v393_v25 = vsel %vm2223_vm13, %v1746_v60, %v389_v16  ;;  %vm406_vm14 = vweird.f32 %v1750_v14 }
  0xe0   :  { %1753 = vrcp.f32 %v2217_v15  ;;  %v398_v34 = vsel %vm395_vm15, %v397_v28, %v393_v25  ;;  %vm407_vm1 = vmor %vm405_vm0, %vm406_vm14  ;;  %vm420_vm4 = vweird.f32 %v2217_v15  ;;  %v424_v52 = vand.u32 2147483647, %v2217_v15 }
  0xe1   :  { %v402_v18 = vsub.f32 1.0, %v401_v49  ;;  %v541_v41 = vmul.f32 %v398_v34, %v2182_v20 }
  0xe2   :  { %v216_v23 = vpop.f32.mrf.mxu0  ;;  %vm425_vm7 = vcmp.eq.f32.partialorder %v424_v52, 8.507059e+37 }
  0xe3   :  { %v403_v26 = vmul.f32 %v1750_v14, %v402_v18  ;;  %v2230_v27 = vadd.f32 %v2125_v11, %v216_v23 }
  0xe5   :  { %v1752_v29 = vpop.eup %1751  ;;  %v404_v30 = vadd.f32 %v1750_v14, %v403_v26  ;;  %v1601_v31 = vmul.f32 -1.442695, %v2230_v27 }
  0xe6   :  { %v1754_v32 = vpop.eup %1753  ;;  %v288_v36 = vadd.f32 1.0, %v1752_v29 }
  0xe7   :  { %v408_v37 = vsel %vm407_vm1, %v1750_v14, %v404_v30  ;;  %v416_v38 = vmul.f32 %v1754_v32, %v2217_v15  ;;  %1755 = vpow2.f32 %v1601_v31  ;;  %vm421_vm3 = vweird.f32 %v1754_v32 }
  0xe8   :  { %v413_v40 = vsel %vm410_vm2, %v412_v35, %v408_v37  ;;  %1757 = vrcp.f32 %v288_v36  ;;  %vm2247_vm5 = vmor %vm420_vm4, %vm421_vm3  ;;  %v439_v56 = vand.u32 2147483647, %v288_v36  ;;  %v441_v57 = vand.u32 2147483648, %v288_v36 }
  0xe9   :  { %v542_v42 = vmul.f32 %v413_v40, %v2189_v39  ;;  %v417_v43 = vsub.f32 1.0, %v416_v38  ;;  %v426_v39 = vand.u32 2147483648, %v2217_v15  ;;  %vm435_vm8 = vweird.f32 %v288_v36 }
  0xea   :  { %v218_v44 = vpop.f32.mrf.mxu0  ;;  %v442_v5 = vor.u32 1.1754944e-38, %v441_v57  ;;  %vm440_vm11 = vcmp.eq.f32.partialorder %v439_v56, 8.507059e+37 }
  0xeb   :  { %v418_v45 = vmul.f32 %v1754_v32, %v417_v43  ;;  %v2237_v24 = vadd.f32 %v2125_v11, %v218_v44  ;;  %v554_v33 = vpack.c.bf16 %v542_v42, %v541_v41  ;;  %v427_v62 = vor.u32 1.1754944e-38, %v426_v39 }
  0xed   :  { %v1756_v46 = vpop.eup %1755  ;;  %v1602_v47 = vmul.f32 -1.442695, %v2237_v24  ;;  %1626 = vmatmul.msk.bf16.gmra.mxu1 %vm595_vm9, %v554_v33  ;;  %v419_v51 = vadd.f32 %v1754_v32, %v418_v45 }
  0xee   :  { %v1758_v48 = vpop.eup %1757  ;;  %v2241_v50 = vadd.f32 1.0, %v1756_v46 }
  0xef   :  { %v431_v20 = vmul.f32 %v1758_v48, %v288_v36  ;;  %1759 = vpow2.f32 %v1602_v47  ;;  %v423_v59 = vsel %vm2247_vm5, %v1754_v32, %v419_v51  ;;  %vm436_vm6 = vweird.f32 %v1758_v48 }
  0xf0   :  { %1761 = vrcp.f32 %v2241_v50  ;;  %v428_v4 = vsel %vm425_vm7, %v427_v62, %v423_v59  ;;  %vm437_vm10 = vmor %vm435_vm8, %vm436_vm6  ;;  %vm450_vm13 = vweird.f32 %v2241_v50  ;;  %v454_v23 = vand.u32 2147483647, %v2241_v50 }
  0xf1   :  { %v432_v53 = vsub.f32 1.0, %v431_v20  ;;  %v543_v12 = vmul.f32 %v428_v4, %v2206_v55 }
  0xf2   :  { %v221_v58 = vpop.f32.mrf.mxu0  ;;  %vm455_vm0 = vcmp.eq.f32.partialorder %v454_v23, 8.507059e+37 }
  0xf3   :  { %v433_v60 = vmul.f32 %v1758_v48, %v432_v53  ;;  %v2254_v61 = vadd.f32 %v2125_v11, %v221_v58 }
  0xf5   :  { %v1760_v63 = vpop.eup %1759  ;;  %v434_v0 = vadd.f32 %v1758_v48, %v433_v60  ;;  %v1603_v1 = vmul.f32 -1.442695, %v2254_v61 }
  0xf6   :  { %v1762_v3 = vpop.eup %1761  ;;  %v290_v6 = vadd.f32 1.0, %v1760_v63 }
  0xf7   :  { %v438_v7 = vsel %vm437_vm10, %v1758_v48, %v434_v0  ;;  %v446_v8 = vmul.f32 %v1762_v3, %v2241_v50  ;;  %1763 = vpow2.f32 %v1603_v1  ;;  %vm451_vm12 = vweird.f32 %v1762_v3 }
  0xf8   :  { %v443_v10 = vsel %vm440_vm11, %v442_v5, %v438_v7  ;;  %1765 = vrcp.f32 %v290_v6  ;;  %vm2271_vm14 = vmor %vm450_vm13, %vm451_vm12  ;;  %v469_v28 = vand.u32 2147483647, %v290_v6  ;;  %v471_v29 = vand.u32 2147483648, %v290_v6 }
  0xf9   :  { %v544_v13 = vmul.f32 %v443_v10, %v2213_v9  ;;  %v447_v14 = vsub.f32 1.0, %v446_v8  ;;  %v456_v9 = vand.u32 2147483648, %v2241_v50  ;;  %vm465_vm1 = vweird.f32 %v290_v6 }
  0xfa   :  { %v223_v15 = vpop.f32.mrf.mxu0  ;;  %v472_v42 = vor.u32 1.1754944e-38, %v471_v29  ;;  %vm470_vm3 = vcmp.eq.f32.partialorder %v469_v28, 8.507059e+37 }
  0xfb   :  { %v448_v16 = vmul.f32 %v1762_v3, %v447_v14  ;;  %v2261_v49 = vadd.f32 %v2125_v11, %v223_v15  ;;  %v555_v2 = vpack.c.bf16 %v544_v13, %v543_v12  ;;  %v457_v35 = vor.u32 1.1754944e-38, %v456_v9 }
  0xfd   :  { %v1764_v17 = vpop.eup %1763  ;;  %v1604_v18 = vmul.f32 -1.442695, %v2261_v49  ;;  %1627 = vmatmul.msk.bf16.gmra.mxu1 %vm595_vm9, %v555_v2  ;;  %v449_v22 = vadd.f32 %v1762_v3, %v448_v16 }
  0xfe   :  { %v1766_v19 = vpop.eup %1765  ;;  %v2265_v21 = vadd.f32 1.0, %v1764_v17 }
  0xff   :  { %v461_v55 = vmul.f32 %v1766_v19, %v290_v6  ;;  %1767 = vpow2.f32 %v1604_v18  ;;  %v453_v31 = vsel %vm2271_vm14, %v1762_v3, %v449_v22  ;;  %vm466_vm15 = vweird.f32 %v1766_v19 }
 0x100   :  { %1769 = vrcp.f32 %v2265_v21  ;;  %v458_v41 = vsel %vm455_vm0, %v457_v35, %v453_v31  ;;  %vm467_vm2 = vmor %vm465_vm1, %vm466_vm15  ;;  %vm480_vm5 = vweird.f32 %v2265_v21 }
 0x101   :  { %v462_v25 = vsub.f32 1.0, %v461_v55  ;;  %v545_v46 = vmul.f32 %v458_v41, %v2230_v27  ;;  %v486_v27 = vand.u32 2147483648, %v2265_v21 }
 0x102   :  { %v226_v30 = vpop.f32.mrf.mxu0 }
 0x103   :  { %v463_v32 = vmul.f32 %v1766_v19, %v462_v25  ;;  %v2278_v34 = vadd.f32 %v2125_v11, %v226_v30  ;;  %v487_v0 = vor.u32 1.1754944e-38, %v486_v27 }
 0x105   :  { %v1768_v36 = vpop.eup %1767  ;;  %v464_v37 = vadd.f32 %v1766_v19, %v463_v32  ;;  %v1605_v38 = vmul.f32 -1.442695, %v2278_v34 }
 0x106   :  { %v1770_v40 = vpop.eup %1769  ;;  %v292_v43 = vadd.f32 1.0, %v1768_v36 }
 0x107   :  { %v468_v44 = vsel %vm467_vm2, %v1766_v19, %v464_v37  ;;  %v476_v45 = vmul.f32 %v1770_v40, %v2265_v21  ;;  %1771 = vpow2.f32 %v1605_v38  ;;  %vm481_vm4 = vweird.f32 %v1770_v40  ;;  %v1707_v37 = vld [vmem:[%s2739_s5 + $0x18] sm:$0xff]  ;;  %v2301_v38 = vld [vmem:[#allocation2] ss:$0 sm:$0xff] }
 0x108   :  { %v473_v33 = vsel %vm470_vm3, %v472_v42, %v468_v44  ;;  %1773 = vrcp.f32 %v292_v43  ;;  %vm482_vm6 = vmor %vm480_vm5, %vm481_vm4  ;;  %v501_v59 = vand.u32 2147483648, %v292_v43  ;;  %v499_v63 = vand.u32 2147483647, %v292_v43  ;;  %1061 = vmatpush.bf16.msra.mxu2 %v1707_v37  ;;  %v1704_v44 = vld [vmem:[%s2739_s5] sm:$0xff] }
 0x109   :  { %v546_v47 = vmul.f32 %v473_v33, %v2237_v24  ;;  %v477_v48 = vsub.f32 1.0, %v476_v45  ;;  %vm495_vm10 = vweird.f32 %v292_v43 }
 0x10a   :  { %v228_v50 = vpop.f32.mrf.mxu0  ;;  %v502_v6 = vor.u32 1.1754944e-38, %v501_v59  ;;  %vm500_vm12 = vcmp.eq.f32.partialorder %v499_v63, 8.507059e+37 }
 0x10b   :  { %v478_v51 = vmul.f32 %v1770_v40, %v477_v48  ;;  %v2285_v20 = vadd.f32 %v2125_v11, %v228_v50  ;;  %v556_v39 = vpack.c.bf16 %v546_v47, %v545_v46  ;;  %v484_v11 = vand.u32 2147483647, %v2265_v21 }
 0x10d   :  { %v1772_v52 = vpop.eup %1771  ;;  %v1606_v53 = vmul.f32 -1.442695, %v2285_v20  ;;  %1628 = vmatmul.msk.bf16.gmra.mxu1 %vm595_vm9, %v556_v39  ;;  %v479_v57 = vadd.f32 %v1770_v40, %v478_v51  ;;  %vm485_vm8 = vcmp.eq.f32.partialorder %v484_v11, 8.507059e+37 }
 0x10e   :  { %v1774_v54 = vpop.eup %1773  ;;  %v293_v56 = vadd.f32 1.0, %v1772_v52 }
 0x10f   :  { %v491_v58 = vmul.f32 %v1774_v54, %v292_v43  ;;  %1775 = vpow2.f32 %v1606_v53  ;;  %v483_v60 = vsel %vm482_vm6, %v1770_v40, %v479_v57  ;;  %vm496_vm7 = vweird.f32 %v1774_v54  ;;  %v1706_v40 = vld [vmem:[%s2739_s5 + $0x10] sm:$0xff]  ;;  %v1705_v43 = vld [vmem:[%s2739_s5 + $0x8] sm:$0xff] }
 0x110   :  { %1777 = vrcp.f32 %v293_v56  ;;  %v488_v5 = vsel %vm485_vm8, %v487_v0, %v483_v60  ;;  %vm497_vm11 = vmor %vm495_vm10, %vm496_vm7  ;;  %v516_v21 = vand.u32 2147483648, %v293_v56  ;;  %vm510_vm14 = vweird.f32 %v293_v56  ;;  %1062 = vmatpush.bf16.msra.mxu2 %v1706_v40 }
 0x111   :  { %v492_v24 = vsub.f32 1.0, %v491_v58  ;;  %v547_v13 = vmul.f32 %v488_v5, %v2254_v61  ;;  %v514_v22 = vand.u32 2147483647, %v293_v56 }
 0x113   :  { %v493_v62 = vmul.f32 %v1774_v54, %v492_v24  ;;  %vm515_vm1 = vcmp.eq.f32.partialorder %v514_v22, 8.507059e+37 }
 0x114   :  { %1063 = vmatpush.bf16.msra.mxu2 %v1705_v43 }
 0x115   :  { %v1776_v1 = vpop.eup %1775  ;;  %v494_v3 = vadd.f32 %v1774_v54, %v493_v62 }
 0x116   :  { %v1778_v4 = vpop.eup %1777  ;;  %v294_v7 = vadd.f32 1.0, %v1776_v1 }
 0x117   :  { %v498_v8 = vsel %vm497_vm11, %v1774_v54, %v494_v3  ;;  %v506_v10 = vmul.f32 %v1778_v4, %v293_v56  ;;  %vm511_vm13 = vweird.f32 %v1778_v4 }
 0x118   :  { %v503_v12 = vsel %vm500_vm12, %v502_v6, %v498_v8  ;;  %1779 = vrcp.f32 %v294_v7  ;;  %vm512_vm15 = vmor %vm510_vm14, %vm511_vm13  ;;  %v531_v9 = vand.u32 2147483648, %v294_v7  ;;  %v529_v61 = vand.u32 2147483647, %v294_v7  ;;  %1064 = vmatpush.bf16.msra.mxu2 %v1704_v44 }
 0x119   :  { %v548_v14 = vmul.f32 %v503_v12, %v2261_v49  ;;  %v507_v15 = vsub.f32 1.0, %v506_v10  ;;  %v517_v49 = vor.u32 1.1754944e-38, %v516_v21  ;;  %vm525_vm2 = vweird.f32 %v294_v7 }
 0x11a   :  { %v532_v29 = vor.u32 1.1754944e-38, %v531_v9  ;;  %vm530_vm4 = vcmp.eq.f32.partialorder %v529_v61, 8.507059e+37 }
 0x11b   :  { %v508_v16 = vmul.f32 %v1778_v4, %v507_v15  ;;  %v557_v2 = vpack.c.bf16 %v548_v14, %v547_v13 }
 0x11d   :  { %1629 = vmatmul.msk.bf16.gmra.mxu1 %vm595_vm9, %v557_v2  ;;  %v509_v18 = vadd.f32 %v1778_v4, %v508_v16 }
 0x11e   :  { %v1780_v17 = vpop.eup %1779 }
 0x11f   :  { %v521_v19 = vmul.f32 %v1780_v17, %v294_v7  ;;  %v513_v23 = vsel %vm512_vm15, %v1778_v4, %v509_v18  ;;  %vm526_vm0 = vweird.f32 %v1780_v17 }
 0x120   :  { %v518_v28 = vsel %vm515_vm1, %v517_v49, %v513_v23  ;;  %vm527_vm3 = vmor %vm525_vm2, %vm526_vm0 }
 0x121   :  { %v522_v55 = vsub.f32 1.0, %v521_v19  ;;  %v549_v32 = vmul.f32 %v518_v28, %v2278_v34 }
 0x123   :  { %v523_v25 = vmul.f32 %v1780_v17, %v522_v55 }
 0x125   :  { %v524_v26 = vadd.f32 %v1780_v17, %v523_v25 }
 0x127   :  { %v528_v30 = vsel %vm527_vm3, %v1780_v17, %v524_v26 }
 0x128   :  { %v533_v31 = vsel %vm530_vm4, %v532_v29, %v528_v30 }
 0x129   :  { %v550_v35 = vmul.f32 %v533_v31, %v2285_v20 }
 0x12b   :  { %v558_v36 = vpack.c.bf16 %v550_v35, %v549_v32 }
 0x12d   :  { %1630 = vmatmul.msk.bf16.gmra.mxu1 %vm595_vm9, %v558_v36 }
 0x13a   :  { %v629_v41 = vpop.f32.mrf.mxu1 }
 0x13b   :  { %v2307_v42 = vadd.f32 %v2301_v38, %v629_v41 }
 0x13d   :  { %v1631_v34 = vmul.f32 -1.442695, %v2307_v42 }
 0x13f   :  { %1781 = vpow2.f32 %v1631_v34 }
 0x142   :  { %v631_v45 = vpop.f32.mrf.mxu1 }
 0x143   :  { %v632_v33 = vadd.f32 %v2301_v38, %v631_v45 }
 0x145   :  { %v1782_v46 = vpop.eup %1781  ;;  %v1632_v47 = vmul.f32 -1.442695, %v632_v33 }
 0x146   :  { %v717_v48 = vadd.f32 1.0, %v1782_v46 }
 0x147   :  { %1783 = vpow2.f32 %v1632_v47 }
 0x148   :  { %1785 = vrcp.f32 %v717_v48  ;;  %v744_v0 = vand.u32 2147483648, %v717_v48  ;;  %vm738_vm6 = vweird.f32 %v717_v48  ;;  %v742_v1 = vand.u32 2147483647, %v717_v48 }
 0x14a   :  { %v634_v50 = vpop.f32.mrf.mxu1  ;;  %v745_v13 = vor.u32 1.1754944e-38, %v744_v0  ;;  %vm743_vm10 = vcmp.eq.f32.partialorder %v742_v1, 8.507059e+37 }
 0x14b   :  { %v2318_v51 = vadd.f32 %v2301_v38, %v634_v50 }
 0x14d   :  { %v1784_v20 = vpop.eup %1783  ;;  %v1633_v39 = vmul.f32 -1.442695, %v2318_v51 }
 0x14e   :  { %v1786_v52 = vpop.eup %1785  ;;  %v718_v53 = vadd.f32 1.0, %v1784_v20 }
 0x14f   :  { %v734_v54 = vmul.f32 %v1786_v52, %v717_v48  ;;  %1787 = vpow2.f32 %v1633_v39  ;;  %vm739_vm5 = vweird.f32 %v1786_v52 }
 0x150   :  { %1789 = vrcp.f32 %v718_v53  ;;  %vm2328_vm7 = vmor %vm738_vm6, %vm739_vm5  ;;  %v757_v5 = vand.u32 2147483647, %v718_v53  ;;  %v759_v6 = vand.u32 2147483648, %v718_v53  ;;  %vm753_vm11 = vweird.f32 %v718_v53 }
 0x151   :  { %v735_v56 = vsub.f32 1.0, %v734_v54 }
 0x152   :  { %v636_v57 = vpop.f32.mrf.mxu1  ;;  %v760_v18 = vor.u32 1.1754944e-38, %v759_v6  ;;  %vm758_vm13 = vcmp.eq.f32.partialorder %v757_v5, 8.507059e+37 }
 0x153   :  { %v736_v58 = vmul.f32 %v1786_v52, %v735_v56  ;;  %v2322_v27 = vadd.f32 %v2301_v38, %v636_v57 }
 0x155   :  { %v1788_v11 = vpop.eup %1787  ;;  %v1634_v24 = vmul.f32 -1.442695, %v2322_v27  ;;  %v737_v62 = vadd.f32 %v1786_v52, %v736_v58 }
 0x156   :  { %v1790_v59 = vpop.eup %1789  ;;  %v2325_v60 = vadd.f32 1.0, %v1788_v11 }
 0x157   :  { %v749_v63 = vmul.f32 %v1790_v59, %v718_v53  ;;  %1791 = vpow2.f32 %v1634_v24  ;;  %v741_v8 = vsel %vm2328_vm7, %v1786_v52, %v737_v62  ;;  %vm754_vm8 = vweird.f32 %v1790_v59 }
 0x158   :  { %1793 = vrcp.f32 %v2325_v60  ;;  %v746_v17 = vsel %vm743_vm10, %v745_v13, %v741_v8  ;;  %vm755_vm12 = vmor %vm753_vm11, %vm754_vm8  ;;  %v774_v37 = vand.u32 2147483648, %v2325_v60  ;;  %vm768_vm15 = vweird.f32 %v2325_v60 }
 0x159   :  { %v750_v3 = vsub.f32 1.0, %v749_v63  ;;  %v973_v9 = vmul.f32 %v746_v17, %v2307_v42  ;;  %v772_v40 = vand.u32 2147483647, %v2325_v60 }
 0x15a   :  { %v639_v7 = vpop.f32.mrf.mxu1  ;;  %v775_v47 = vor.u32 1.1754944e-38, %v774_v37 }
 0x15b   :  { %v751_v10 = vmul.f32 %v1790_v59, %v750_v3  ;;  %v2335_v12 = vadd.f32 %v2301_v38, %v639_v7  ;;  %vm773_vm2 = vcmp.eq.f32.partialorder %v772_v40, 8.507059e+37 }
 0x15d   :  { %v1792_v14 = vpop.eup %1791  ;;  %v752_v15 = vadd.f32 %v1790_v59, %v751_v10  ;;  %v1635_v16 = vmul.f32 -1.442695, %v2335_v12 }
 0x15e   :  { %v1794_v2 = vpop.eup %1793  ;;  %v720_v19 = vadd.f32 1.0, %v1792_v14 }
 0x15f   :  { %v756_v21 = vsel %vm755_vm12, %v1790_v59, %v752_v15  ;;  %v764_v22 = vmul.f32 %v1794_v2, %v2325_v60  ;;  %1795 = vpow2.f32 %v1635_v16  ;;  %vm769_vm14 = vweird.f32 %v1794_v2 }
 0x160   :  { %v761_v55 = vsel %vm758_vm13, %v760_v18, %v756_v21  ;;  %1797 = vrcp.f32 %v720_v19  ;;  %vm2351_vm0 = vmor %vm768_vm15, %vm769_vm14  ;;  %v787_v34 = vand.u32 2147483647, %v720_v19  ;;  %v789_v43 = vand.u32 2147483648, %v720_v19 }
 0x161   :  { %v974_v23 = vmul.f32 %v761_v55, %v632_v33  ;;  %v765_v25 = vsub.f32 1.0, %v764_v22  ;;  %vm783_vm3 = vweird.f32 %v720_v19 }
 0x162   :  { %v641_v61 = vpop.f32.mrf.mxu1  ;;  %v790_v53 = vor.u32 1.1754944e-38, %v789_v43  ;;  %vm788_vm5 = vcmp.eq.f32.partialorder %v787_v34, 8.507059e+37 }
 0x163   :  { %v766_v49 = vmul.f32 %v1794_v2, %v765_v25  ;;  %v2341_v26 = vadd.f32 %v2301_v38, %v641_v61  ;;  %v989_v28 = vpack.c.bf16 %v974_v23, %v973_v9 }
 0x165   :  { %v1796_v29 = vpop.eup %1795  ;;  %v1636_v30 = vmul.f32 -1.442695, %v2341_v26  ;;  %1663 = vmatmul.msk.bf16.vlgmr.msra.gmra.mxu2 %vm595_vm9, %v989_v28  ;;  %v767_v35 = vadd.f32 %v1794_v2, %v766_v49 }
 0x166   :  { %v1798_v31 = vpop.eup %1797  ;;  %v2345_v32 = vadd.f32 1.0, %v1796_v29 }
 0x167   :  { %v779_v36 = vmul.f32 %v1798_v31, %v720_v19  ;;  %1799 = vpow2.f32 %v1636_v30  ;;  %v771_v45 = vsel %vm2351_vm0, %v1794_v2, %v767_v35  ;;  %vm784_vm1 = vweird.f32 %v1798_v31 }
 0x168   :  { %1801 = vrcp.f32 %v2345_v32  ;;  %v776_v52 = vsel %vm773_vm2, %v775_v47, %v771_v45  ;;  %vm785_vm4 = vmor %vm783_vm3, %vm784_vm1  ;;  %vm798_vm7 = vweird.f32 %v2345_v32  ;;  %v802_v7 = vand.u32 2147483647, %v2345_v32 }
 0x169   :  { %v780_v41 = vsub.f32 1.0, %v779_v36  ;;  %v975_v11 = vmul.f32 %v776_v52, %v2318_v51 }
 0x16a   :  { %v644_v44 = vpop.f32.mrf.mxu1  ;;  %vm803_vm11 = vcmp.eq.f32.partialorder %v802_v7, 8.507059e+37 }
 0x16b   :  { %v781_v33 = vmul.f32 %v1798_v31, %v780_v41  ;;  %v2358_v46 = vadd.f32 %v2301_v38, %v644_v44 }
 0x16d   :  { %v1800_v48 = vpop.eup %1799  ;;  %v782_v50 = vadd.f32 %v1798_v31, %v781_v33  ;;  %v1637_v20 = vmul.f32 -1.442695, %v2358_v46 }
 0x16e   :  { %v1802_v39 = vpop.eup %1801  ;;  %v722_v54 = vadd.f32 1.0, %v1800_v48 }
 0x16f   :  { %v786_v56 = vsel %vm785_vm4, %v1798_v31, %v782_v50  ;;  %v794_v57 = vmul.f32 %v1802_v39, %v2345_v32  ;;  %1803 = vpow2.f32 %v1637_v20  ;;  %vm799_vm6 = vweird.f32 %v1802_v39 }
 0x170   :  { %v791_v58 = vsel %vm788_vm5, %v790_v53, %v786_v56  ;;  %1805 = vrcp.f32 %v722_v54  ;;  %vm2375_vm8 = vmor %vm798_vm7, %vm799_vm6  ;;  %v817_v13 = vand.u32 2147483647, %v722_v54  ;;  %v819_v14 = vand.u32 2147483648, %v722_v54 }
 0x171   :  { %v976_v24 = vmul.f32 %v791_v58, %v2322_v27  ;;  %v795_v59 = vsub.f32 1.0, %v794_v57  ;;  %v804_v27 = vand.u32 2147483648, %v2345_v32  ;;  %vm813_vm12 = vweird.f32 %v722_v54 }
 0x172   :  { %v646_v60 = vpop.f32.mrf.mxu1  ;;  %v820_v23 = vor.u32 1.1754944e-38, %v819_v14  ;;  %vm818_vm14 = vcmp.eq.f32.partialorder %v817_v13, 8.507059e+37 }
 0x173   :  { %v796_v62 = vmul.f32 %v1802_v39, %v795_v59  ;;  %v2365_v63 = vadd.f32 %v2301_v38, %v646_v60  ;;  %v990_v0 = vpack.c.bf16 %v976_v24, %v975_v11  ;;  %v805_v18 = vor.u32 1.1754944e-38, %v804_v27 }
 0x175   :  { %v1804_v1 = vpop.eup %1803  ;;  %v1638_v3 = vmul.f32 -1.442695, %v2365_v63  ;;  %1664 = vmatmul.msk.bf16.gmra.mxu2 %vm595_vm9, %v990_v0  ;;  %v797_v6 = vadd.f32 %v1802_v39, %v796_v62 }
 0x176   :  { %v1806_v4 = vpop.eup %1805  ;;  %v2369_v5 = vadd.f32 1.0, %v1804_v1 }
 0x177   :  { %v809_v51 = vmul.f32 %v1806_v4, %v722_v54  ;;  %1807 = vpow2.f32 %v1638_v3  ;;  %v801_v16 = vsel %vm2375_vm8, %v1802_v39, %v797_v6  ;;  %vm814_vm10 = vweird.f32 %v1806_v4 }
 0x178   :  { %1809 = vrcp.f32 %v2369_v5  ;;  %v806_v9 = vsel %vm803_vm11, %v805_v18, %v801_v16  ;;  %vm815_vm13 = vmor %vm813_vm12, %vm814_vm10  ;;  %vm828_vm0 = vweird.f32 %v2369_v5  ;;  %v832_v44 = vand.u32 2147483647, %v2369_v5 }
 0x179   :  { %v810_v8 = vsub.f32 1.0, %v809_v51  ;;  %v977_v29 = vmul.f32 %v806_v9, %v2335_v12 }
 0x17a   :  { %v649_v15 = vpop.f32.mrf.mxu1  ;;  %vm833_vm3 = vcmp.eq.f32.partialorder %v832_v44, 8.507059e+37 }
 0x17b   :  { %v811_v2 = vmul.f32 %v1806_v4, %v810_v8  ;;  %v2382_v17 = vadd.f32 %v2301_v38, %v649_v15 }
 0x17d   :  { %v1808_v19 = vpop.eup %1807  ;;  %v812_v21 = vadd.f32 %v1806_v4, %v811_v2  ;;  %v1639_v22 = vmul.f32 -1.442695, %v2382_v17 }
 0x17e   :  { %v1810_v55 = vpop.eup %1809  ;;  %v724_v25 = vadd.f32 1.0, %v1808_v19 }
 0x17f   :  { %v816_v61 = vsel %vm815_vm13, %v1806_v4, %v812_v21  ;;  %v824_v49 = vmul.f32 %v1810_v55, %v2369_v5  ;;  %1811 = vpow2.f32 %v1639_v22  ;;  %vm829_vm15 = vweird.f32 %v1810_v55 }
 0x180   :  { %v821_v28 = vsel %vm818_vm14, %v820_v23, %v816_v61  ;;  %1813 = vrcp.f32 %v724_v25  ;;  %vm2399_vm1 = vmor %vm828_vm0, %vm829_vm15  ;;  %v847_v47 = vand.u32 2147483647, %v724_v25  ;;  %v849_v48 = vand.u32 2147483648, %v724_v25 }
 0x181   :  { %v978_v30 = vmul.f32 %v821_v28, %v2341_v26  ;;  %v825_v31 = vsub.f32 1.0, %v824_v49  ;;  %v834_v26 = vand.u32 2147483648, %v2369_v5  ;;  %vm843_vm4 = vweird.f32 %v724_v25 }
 0x182   :  { %v651_v32 = vpop.f32.mrf.mxu1  ;;  %v850_v24 = vor.u32 1.1754944e-38, %v849_v48  ;;  %vm848_vm6 = vcmp.eq.f32.partialorder %v847_v47, 8.507059e+37 }
 0x183   :  { %v826_v35 = vmul.f32 %v1810_v55, %v825_v31  ;;  %v2389_v36 = vadd.f32 %v2301_v38, %v651_v32  ;;  %v991_v37 = vpack.c.bf16 %v978_v30, %v977_v29  ;;  %v835_v53 = vor.u32 1.1754944e-38, %v834_v26 }
 0x185   :  { %v1812_v40 = vpop.eup %1811  ;;  %v1640_v41 = vmul.f32 -1.442695, %v2389_v36  ;;  %1665 = vmatmul.msk.bf16.gmra.mxu2 %vm595_vm9, %v991_v37  ;;  %v827_v43 = vadd.f32 %v1810_v55, %v826_v35 }
 0x186   :  { %v1814_v42 = vpop.eup %1813  ;;  %v2393_v34 = vadd.f32 1.0, %v1812_v40 }
 0x187   :  { %v839_v12 = vmul.f32 %v1814_v42, %v724_v25  ;;  %1815 = vpow2.f32 %v1640_v41  ;;  %v831_v20 = vsel %vm2399_vm1, %v1810_v55, %v827_v43  ;;  %vm844_vm2 = vweird.f32 %v1814_v42 }
 0x188   :  { %1817 = vrcp.f32 %v2393_v34  ;;  %v836_v11 = vsel %vm833_vm3, %v835_v53, %v831_v20  ;;  %vm845_vm5 = vmor %vm843_vm4, %vm844_vm2  ;;  %vm858_vm8 = vweird.f32 %v2393_v34  ;;  %v862_v15 = vand.u32 2147483647, %v2393_v34 }
 0x189   :  { %v840_v45 = vsub.f32 1.0, %v839_v12  ;;  %v979_v1 = vmul.f32 %v836_v11, %v2358_v46 }
 0x18a   :  { %v654_v50 = vpop.f32.mrf.mxu1  ;;  %vm863_vm12 = vcmp.eq.f32.partialorder %v862_v15, 8.507059e+37 }
 0x18b   :  { %v841_v39 = vmul.f32 %v1814_v42, %v840_v45  ;;  %v2406_v52 = vadd.f32 %v2301_v38, %v654_v50 }
 0x18d   :  { %v1816_v54 = vpop.eup %1815  ;;  %v842_v56 = vadd.f32 %v1814_v42, %v841_v39  ;;  %v1641_v57 = vmul.f32 -1.442695, %v2406_v52 }
 0x18e   :  { %v1818_v58 = vpop.eup %1817  ;;  %v726_v59 = vadd.f32 1.0, %v1816_v54 }
 0x18f   :  { %v846_v60 = vsel %vm845_vm5, %v1814_v42, %v842_v56  ;;  %v854_v62 = vmul.f32 %v1818_v58, %v2393_v34  ;;  %1819 = vpow2.f32 %v1641_v57  ;;  %vm859_vm7 = vweird.f32 %v1818_v58 }
 0x190   :  { %v851_v0 = vsel %vm848_vm6, %v850_v24, %v846_v60  ;;  %1821 = vrcp.f32 %v726_v59  ;;  %vm2423_vm10 = vmor %vm858_vm8, %vm859_vm7  ;;  %v877_v18 = vand.u32 2147483647, %v726_v59  ;;  %v879_v19 = vand.u32 2147483648, %v726_v59 }
 0x191   :  { %v980_v3 = vmul.f32 %v851_v0, %v2365_v63  ;;  %v855_v4 = vsub.f32 1.0, %v854_v62  ;;  %v864_v63 = vand.u32 2147483648, %v2393_v34  ;;  %vm873_vm13 = vweird.f32 %v726_v59 }
 0x192   :  { %v656_v5 = vpop.f32.mrf.mxu1  ;;  %v880_v30 = vor.u32 1.1754944e-38, %v879_v19  ;;  %vm878_vm15 = vcmp.eq.f32.partialorder %v877_v18, 8.507059e+37 }
 0x193   :  { %v856_v6 = vmul.f32 %v1818_v58, %v855_v4  ;;  %v2413_v51 = vadd.f32 %v2301_v38, %v656_v5  ;;  %v992_v27 = vpack.c.bf16 %v980_v3, %v979_v1  ;;  %v865_v23 = vor.u32 1.1754944e-38, %v864_v63 }
 0x195   :  { %v1820_v7 = vpop.eup %1819  ;;  %v1642_v8 = vmul.f32 -1.442695, %v2413_v51  ;;  %1666 = vmatmul.msk.bf16.gmra.mxu2 %vm595_vm9, %v992_v27  ;;  %v857_v14 = vadd.f32 %v1818_v58, %v856_v6 }
 0x196   :  { %v1822_v10 = vpop.eup %1821  ;;  %v2417_v13 = vadd.f32 1.0, %v1820_v7 }
 0x197   :  { %v869_v46 = vmul.f32 %v1822_v10, %v726_v59  ;;  %1823 = vpow2.f32 %v1642_v8  ;;  %v861_v22 = vsel %vm2423_vm10, %v1818_v58, %v857_v14  ;;  %vm874_vm11 = vweird.f32 %v1822_v10 }
 0x198   :  { %1825 = vrcp.f32 %v2417_v13  ;;  %v866_v29 = vsel %vm863_vm12, %v865_v23, %v861_v22  ;;  %vm875_vm14 = vmor %vm873_vm13, %vm874_vm11  ;;  %vm888_vm1 = vweird.f32 %v2417_v13  ;;  %v892_v50 = vand.u32 2147483647, %v2417_v13 }
 0x199   :  { %v870_v16 = vsub.f32 1.0, %v869_v46  ;;  %v981_v40 = vmul.f32 %v866_v29, %v2382_v17 }
 0x19a   :  { %v659_v21 = vpop.f32.mrf.mxu1  ;;  %vm893_vm4 = vcmp.eq.f32.partialorder %v892_v50, 8.507059e+37 }
 0x19b   :  { %v871_v55 = vmul.f32 %v1822_v10, %v870_v16  ;;  %v2430_v9 = vadd.f32 %v2301_v38, %v659_v21 }
 0x19d   :  { %v1824_v25 = vpop.eup %1823  ;;  %v872_v61 = vadd.f32 %v1822_v10, %v871_v55  ;;  %v1643_v49 = vmul.f32 -1.442695, %v2430_v9 }
 0x19e   :  { %v1826_v28 = vpop.eup %1825  ;;  %v728_v31 = vadd.f32 1.0, %v1824_v25 }
 0x19f   :  { %v876_v32 = vsel %vm875_vm14, %v1822_v10, %v872_v61  ;;  %v884_v35 = vmul.f32 %v1826_v28, %v2417_v13  ;;  %1827 = vpow2.f32 %v1643_v49  ;;  %vm889_vm0 = vweird.f32 %v1826_v28 }
 0x1a0   :  { %v881_v37 = vsel %vm878_vm15, %v880_v30, %v876_v32  ;;  %1829 = vrcp.f32 %v728_v31  ;;  %vm2447_vm2 = vmor %vm888_vm1, %vm889_vm0  ;;  %v907_v53 = vand.u32 2147483647, %v728_v31  ;;  %v909_v54 = vand.u32 2147483648, %v728_v31 }
 0x1a1   :  { %v982_v41 = vmul.f32 %v881_v37, %v2389_v36  ;;  %v885_v42 = vsub.f32 1.0, %v884_v35  ;;  %v894_v36 = vand.u32 2147483648, %v2417_v13  ;;  %vm903_vm5 = vweird.f32 %v728_v31 }
 0x1a2   :  { %v661_v34 = vpop.f32.mrf.mxu1  ;;  %v910_v3 = vor.u32 1.1754944e-38, %v909_v54  ;;  %vm908_vm7 = vcmp.eq.f32.partialorder %v907_v53, 8.507059e+37 }
 0x1a3   :  { %v886_v43 = vmul.f32 %v1826_v28, %v885_v42  ;;  %v2437_v12 = vadd.f32 %v2301_v38, %v661_v34  ;;  %v993_v26 = vpack.c.bf16 %v982_v41, %v981_v40  ;;  %v895_v24 = vor.u32 1.1754944e-38, %v894_v36 }
 0x1a5   :  { %v1828_v44 = vpop.eup %1827  ;;  %v1644_v45 = vmul.f32 -1.442695, %v2437_v12  ;;  %1667 = vmatmul.msk.bf16.gmra.mxu2 %vm595_vm9, %v993_v26  ;;  %v887_v48 = vadd.f32 %v1826_v28, %v886_v43 }
 0x1a6   :  { %v1830_v33 = vpop.eup %1829  ;;  %v2441_v47 = vadd.f32 1.0, %v1828_v44 }
 0x1a7   :  { %v899_v17 = vmul.f32 %v1830_v33, %v728_v31  ;;  %1831 = vpow2.f32 %v1644_v45  ;;  %v891_v57 = vsel %vm2447_vm2, %v1826_v28, %v887_v48  ;;  %vm904_vm3 = vweird.f32 %v1830_v33 }
 0x1a8   :  { %1833 = vrcp.f32 %v2441_v47  ;;  %v896_v1 = vsel %vm893_vm4, %v895_v24, %v891_v57  ;;  %vm905_vm6 = vmor %vm903_vm5, %vm904_vm3  ;;  %vm918_vm10 = vweird.f32 %v2441_v47 }
 0x1a9   :  { %v900_v20 = vsub.f32 1.0, %v899_v17  ;;  %v983_v7 = vmul.f32 %v896_v1, %v2406_v52  ;;  %v924_v52 = vand.u32 2147483648, %v2441_v47 }
 0x1aa   :  { %v664_v56 = vpop.f32.mrf.mxu1 }
 0x1ab   :  { %v901_v58 = vmul.f32 %v1830_v33, %v900_v20  ;;  %v2454_v11 = vadd.f32 %v2301_v38, %v664_v56  ;;  %v925_v61 = vor.u32 1.1754944e-38, %v924_v52 }
 0x1ad   :  { %v1832_v59 = vpop.eup %1831  ;;  %v902_v60 = vadd.f32 %v1830_v33, %v901_v58  ;;  %v1645_v62 = vmul.f32 -1.442695, %v2454_v11 }
 0x1ae   :  { %v1834_v0 = vpop.eup %1833  ;;  %v730_v4 = vadd.f32 1.0, %v1832_v59 }
 0x1af   :  { %v906_v5 = vsel %vm905_vm6, %v1830_v33, %v902_v60  ;;  %v914_v6 = vmul.f32 %v1834_v0, %v2441_v47  ;;  %1835 = vpow2.f32 %v1645_v62  ;;  %vm919_vm8 = vweird.f32 %v1834_v0  ;;  %v2474_v60 = vld [vmem:[#allocation5] ss:$0 sm:$0xff] }
 0x1b0   :  { %v911_v27 = vsel %vm908_vm7, %v910_v3, %v906_v5  ;;  %1837 = vrcp.f32 %v730_v4  ;;  %vm920_vm11 = vmor %vm918_vm10, %vm919_vm8  ;;  %v939_v22 = vand.u32 2147483648, %v730_v4  ;;  %v937_v25 = vand.u32 2147483647, %v730_v4 }
 0x1b1   :  { %v984_v8 = vmul.f32 %v911_v27, %v2413_v51  ;;  %v915_v10 = vsub.f32 1.0, %v914_v6  ;;  %vm933_vm14 = vweird.f32 %v730_v4 }
 0x1b2   :  { %v666_v13 = vpop.f32.mrf.mxu1  ;;  %v940_v31 = vor.u32 1.1754944e-38, %v939_v22  ;;  %vm938_vm0 = vcmp.eq.f32.partialorder %v937_v25, 8.507059e+37 }
 0x1b3   :  { %v916_v14 = vmul.f32 %v1834_v0, %v915_v10  ;;  %v2461_v46 = vadd.f32 %v2301_v38, %v666_v13  ;;  %v994_v63 = vpack.c.bf16 %v984_v8, %v983_v7  ;;  %v922_v38 = vand.u32 2147483647, %v2441_v47 }
 0x1b5   :  { %v1836_v15 = vpop.eup %1835  ;;  %v1646_v16 = vmul.f32 -1.442695, %v2461_v46  ;;  %1668 = vmatmul.msk.bf16.gmra.mxu2 %vm595_vm9, %v994_v63  ;;  %v917_v19 = vadd.f32 %v1834_v0, %v916_v14  ;;  %vm923_vm13 = vcmp.eq.f32.partialorder %v922_v38, 8.507059e+37 }
 0x1b6   :  { %v1838_v2 = vpop.eup %1837  ;;  %v731_v18 = vadd.f32 1.0, %v1836_v15 }
 0x1b7   :  { %v929_v21 = vmul.f32 %v1838_v2, %v730_v4  ;;  %1839 = vpow2.f32 %v1646_v16  ;;  %v921_v55 = vsel %vm920_vm11, %v1834_v0, %v917_v19  ;;  %vm934_vm12 = vweird.f32 %v1838_v2 }
 0x1b8   :  { %1841 = vrcp.f32 %v731_v18  ;;  %v926_v30 = vsel %vm923_vm13, %v925_v61, %v921_v55  ;;  %vm935_vm15 = vmor %vm933_vm14, %vm934_vm12  ;;  %v954_v47 = vand.u32 2147483648, %v731_v18  ;;  %vm948_vm2 = vweird.f32 %v731_v18 }
 0x1b9   :  { %v930_v51 = vsub.f32 1.0, %v929_v21  ;;  %v985_v41 = vmul.f32 %v926_v30, %v2430_v9  ;;  %v952_v48 = vand.u32 2147483647, %v731_v18 }
 0x1bb   :  { %v931_v23 = vmul.f32 %v1838_v2, %v930_v51  ;;  %vm953_vm5 = vcmp.eq.f32.partialorder %v952_v48, 8.507059e+37 }
 0x1bd   :  { %v1840_v49 = vpop.eup %1839  ;;  %v932_v28 = vadd.f32 %v1838_v2, %v931_v23 }
 0x1be   :  { %v1842_v29 = vpop.eup %1841  ;;  %v732_v32 = vadd.f32 1.0, %v1840_v49 }
 0x1bf   :  { %v936_v35 = vsel %vm935_vm15, %v1838_v2, %v932_v28  ;;  %v944_v37 = vmul.f32 %v1842_v29, %v731_v18  ;;  %vm949_vm1 = vweird.f32 %v1842_v29 }
 0x1c0   :  { %v941_v40 = vsel %vm938_vm0, %v940_v31, %v936_v35  ;;  %1843 = vrcp.f32 %v732_v32  ;;  %vm950_vm3 = vmor %vm948_vm2, %vm949_vm1  ;;  %v969_v36 = vand.u32 2147483648, %v732_v32  ;;  %v967_v9 = vand.u32 2147483647, %v732_v32 }
 0x1c1   :  { %v986_v42 = vmul.f32 %v941_v40, %v2437_v12  ;;  %v945_v34 = vsub.f32 1.0, %v944_v37  ;;  %v955_v12 = vor.u32 1.1754944e-38, %v954_v47  ;;  %vm963_vm6 = vweird.f32 %v732_v32 }
 0x1c2   :  { %v970_v54 = vor.u32 1.1754944e-38, %v969_v36  ;;  %vm968_vm8 = vcmp.eq.f32.partialorder %v967_v9, 8.507059e+37 }
 0x1c3   :  { %v946_v43 = vmul.f32 %v1842_v29, %v945_v34  ;;  %v995_v26 = vpack.c.bf16 %v986_v42, %v985_v41 }
 0x1c5   :  { %1669 = vmatmul.msk.bf16.gmra.mxu2 %vm595_vm9, %v995_v26  ;;  %v947_v45 = vadd.f32 %v1842_v29, %v946_v43 }
 0x1c6   :  { %v1844_v44 = vpop.eup %1843 }
 0x1c7   :  { %v959_v33 = vmul.f32 %v1844_v44, %v732_v32  ;;  %v951_v50 = vsel %vm950_vm3, %v1842_v29, %v947_v45  ;;  %vm964_vm4 = vweird.f32 %v1844_v44 }
 0x1c8   :  { %v956_v53 = vsel %vm953_vm5, %v955_v12, %v951_v50  ;;  %vm965_vm7 = vmor %vm963_vm6, %vm964_vm4 }
 0x1c9   :  { %v960_v17 = vsub.f32 1.0, %v959_v33  ;;  %v987_v58 = vmul.f32 %v956_v53, %v2454_v11 }
 0x1cb   :  { %v961_v20 = vmul.f32 %v1844_v44, %v960_v17 }
 0x1cd   :  { %v962_v39 = vadd.f32 %v1844_v44, %v961_v20 }
 0x1cf   :  { %v966_v56 = vsel %vm965_vm7, %v1844_v44, %v962_v39 }
 0x1d0   :  { %v971_v57 = vsel %vm968_vm8, %v970_v54, %v966_v56 }
 0x1d1   :  { %v988_v24 = vmul.f32 %v971_v57, %v2461_v46 }
 0x1d3   :  { %v996_v59 = vpack.c.bf16 %v988_v24, %v987_v58 }
 0x1d5   :  { %1670 = vmatmul.msk.bf16.gmra.mxu2 %vm595_vm9, %v996_v59 }
 0x1e8   :  { %v1066_v62 = vpop.f32.mrf.mxu2 }
 0x1e9   :  { %v1067_v0 = vadd.f32 %v2474_v60, %v1066_v62 }
 0x1eb   :  { %v1671_v1 = vmul.f32 -1.442695, %v1067_v0 }
 0x1ed   :  { %1845 = vpow2.f32 %v1671_v1 }
 0x1f0   :  { %v1068_v3 = vpop.f32.mrf.mxu2 }
 0x1f1   :  { %v1069_v4 = vadd.f32 %v2474_v60, %v1068_v3 }
 0x1f3   :  { %v1846_v5 = vpop.eup %1845  ;;  %v1672_v6 = vmul.f32 -1.442695, %v1069_v4 }
 0x1f4   :  { %v1154_v27 = vadd.f32 1.0, %v1846_v5 }
 0x1f5   :  { %1847 = vpow2.f32 %v1672_v6 }
 0x1f6   :  { %1849 = vrcp.f32 %v1154_v27  ;;  %v1181_v22 = vand.u32 2147483648, %v1154_v27  ;;  %vm1175_vm11 = vweird.f32 %v1154_v27  ;;  %v1179_v55 = vand.u32 2147483647, %v1154_v27 }
 0x1f8   :  { %v1071_v11 = vpop.f32.mrf.mxu2  ;;  %v1182_v32 = vor.u32 1.1754944e-38, %v1181_v22  ;;  %vm1180_vm14 = vcmp.eq.f32.partialorder %v1179_v55, 8.507059e+37 }
 0x1f9   :  { %v2479_v7 = vadd.f32 %v2474_v60, %v1071_v11 }
 0x1fb   :  { %v1848_v8 = vpop.eup %1847  ;;  %v1673_v10 = vmul.f32 -1.442695, %v2479_v7 }
 0x1fc   :  { %v1850_v13 = vpop.eup %1849  ;;  %v1155_v14 = vadd.f32 1.0, %v1848_v8 }
 0x1fd   :  { %v1171_v46 = vmul.f32 %v1850_v13, %v1154_v27  ;;  %1851 = vpow2.f32 %v1673_v10  ;;  %vm1176_vm10 = vweird.f32 %v1850_v13 }
 0x1fe   :  { %1853 = vrcp.f32 %v1155_v14  ;;  %vm2489_vm12 = vmor %vm1175_vm11, %vm1176_vm10  ;;  %v1194_v61 = vand.u32 2147483647, %v1155_v14  ;;  %v1196_v49 = vand.u32 2147483648, %v1155_v14  ;;  %vm1190_vm15 = vweird.f32 %v1155_v14 }
 0x1ff   :  { %v1172_v63 = vsub.f32 1.0, %v1171_v46 }
 0x200   :  { %v1073_v15 = vpop.f32.mrf.mxu2  ;;  %v1197_v34 = vor.u32 1.1754944e-38, %v1196_v49  ;;  %vm1195_vm1 = vcmp.eq.f32.partialorder %v1194_v61, 8.507059e+37 }
 0x201   :  { %v1173_v16 = vmul.f32 %v1850_v13, %v1172_v63  ;;  %v2483_v2 = vadd.f32 %v2474_v60, %v1073_v15 }
 0x203   :  { %v1852_v18 = vpop.eup %1851  ;;  %v1674_v19 = vmul.f32 -1.442695, %v2483_v2  ;;  %v1174_v38 = vadd.f32 %v1850_v13, %v1173_v16 }
 0x204   :  { %v1854_v21 = vpop.eup %1853  ;;  %v2486_v52 = vadd.f32 1.0, %v1852_v18 }
 0x205   :  { %v1186_v51 = vmul.f32 %v1854_v21, %v1155_v14  ;;  %1855 = vpow2.f32 %v1674_v19  ;;  %v1178_v29 = vsel %vm2489_vm12, %v1850_v13, %v1174_v38  ;;  %vm1191_vm13 = vweird.f32 %v1854_v21 }
 0x206   :  { %1857 = vrcp.f32 %v2486_v52  ;;  %v1183_v42 = vsel %vm1180_vm14, %v1182_v32, %v1178_v29  ;;  %vm1192_vm0 = vmor %vm1190_vm15, %vm1191_vm13  ;;  %v1211_v57 = vand.u32 2147483648, %v2486_v52  ;;  %vm1205_vm3 = vweird.f32 %v2486_v52 }
 0x207   :  { %v1187_v23 = vsub.f32 1.0, %v1186_v51  ;;  %v2500_v33 = vmul.f32 %v1183_v42, %v1067_v0  ;;  %v1209_v58 = vand.u32 2147483647, %v2486_v52 }
 0x208   :  { %v1076_v28 = vpop.f32.mrf.mxu2  ;;  %v1212_v6 = vor.u32 1.1754944e-38, %v1211_v57 }
 0x209   :  { %v1188_v30 = vmul.f32 %v1854_v21, %v1187_v23  ;;  %v2496_v31 = vadd.f32 %v2474_v60, %v1076_v28  ;;  %vm1210_vm6 = vcmp.eq.f32.partialorder %v1209_v58, 8.507059e+37 }
 0x20b   :  { %v1856_v35 = vpop.eup %1855  ;;  %v1189_v37 = vadd.f32 %v1854_v21, %v1188_v30  ;;  %v1675_v40 = vmul.f32 -1.442695, %v2496_v31 }
 0x20c   :  { %v1858_v41 = vpop.eup %1857  ;;  %v1157_v43 = vadd.f32 1.0, %v1856_v35 }
 0x20d   :  { %v1193_v26 = vsel %vm1192_vm0, %v1854_v21, %v1189_v37  ;;  %v1201_v44 = vmul.f32 %v1858_v41, %v2486_v52  ;;  %1859 = vpow2.f32 %v1675_v40  ;;  %vm1206_vm2 = vweird.f32 %v1858_v41 }
 0x20e   :  { %v1198_v45 = vsel %vm1195_vm1, %v1197_v34, %v1193_v26  ;;  %1861 = vrcp.f32 %v1157_v43  ;;  %vm2516_vm4 = vmor %vm1205_vm3, %vm1206_vm2  ;;  %v1224_v62 = vand.u32 2147483647, %v1157_v43  ;;  %v1226_v0 = vand.u32 2147483648, %v1157_v43 }
 0x20f   :  { %v2502_v47 = vmul.f32 %v1198_v45, %v1069_v4  ;;  %v1202_v48 = vsub.f32 1.0, %v1201_v44  ;;  %vm1220_vm7 = vweird.f32 %v1157_v43 }
 0x210   :  { %v1078_v17 = vpop.f32.mrf.mxu2  ;;  %v1227_v14 = vor.u32 1.1754944e-38, %v1226_v0  ;;  %vm1225_vm10 = vcmp.eq.f32.partialorder %v1224_v62, 8.507059e+37 }
 0x211   :  { %v1203_v36 = vmul.f32 %v1858_v41, %v1202_v48  ;;  %v2505_v50 = vadd.f32 %v2474_v60, %v1078_v17  ;;  %v1426_v20 = vpack.c.bf16 %v2502_v47, %v2500_v33  ;;  %v1435_v33 = vld [vmem:[%s2742_s8] sm:$0xff] }
 0x212   :  { %v1436_v47 = vld [vmem:[#allocation7] sm:$0xf] }
 0x213   :  { %v1860_v9 = vpop.eup %1859  ;;  %v1676_v12 = vmul.f32 -1.442695, %v2505_v50  ;;  %v1204_v54 = vadd.f32 %v1858_v41, %v1203_v36 }
 0x214   :  { %v1862_v39 = vpop.eup %1861  ;;  %v2510_v53 = vadd.f32 1.0, %v1860_v9 }
 0x215   :  { %v1216_v56 = vmul.f32 %v1862_v39, %v1157_v43  ;;  %1863 = vpow2.f32 %v1676_v12  ;;  %v1208_v3 = vsel %vm2516_vm4, %v1858_v41, %v1204_v54  ;;  %vm1221_vm5 = vweird.f32 %v1862_v39 }
 0x216   :  { %1865 = vrcp.f32 %v2510_v53  ;;  %v1213_v13 = vsel %vm1210_vm6, %v1212_v6, %v1208_v3  ;;  %vm1222_vm8 = vmor %vm1220_vm7, %vm1221_vm5  ;;  %vm1235_vm12 = vweird.f32 %v2510_v53  ;;  %v1239_v28 = vand.u32 2147483647, %v2510_v53 }
 0x217   :  { %v1217_v24 = vsub.f32 1.0, %v1216_v56  ;;  %v2528_v18 = vmul.f32 %v1213_v13, %v2479_v7 }
 0x218   :  { %v1081_v1 = vpop.f32.mrf.mxu2  ;;  %vm1240_vm15 = vcmp.eq.f32.partialorder %v1239_v28, 8.507059e+37 }
 0x219   :  { %v1218_v4 = vmul.f32 %v1862_v39, %v1217_v24  ;;  %v2523_v5 = vadd.f32 %v2474_v60, %v1081_v1 }
 0x21b   :  { %v1864_v27 = vpop.eup %1863  ;;  %v1219_v11 = vadd.f32 %v1862_v39, %v1218_v4  ;;  %v1677_v8 = vmul.f32 -1.442695, %v2523_v5 }
 0x21c   :  { %v1866_v10 = vpop.eup %1865  ;;  %v1159_v46 = vadd.f32 1.0, %v1864_v27 }
 0x21d   :  { %v1223_v63 = vsel %vm1222_vm8, %v1862_v39, %v1219_v11  ;;  %v1231_v15 = vmul.f32 %v1866_v10, %v2510_v53  ;;  %1867 = vpow2.f32 %v1677_v8  ;;  %vm1236_vm11 = vweird.f32 %v1866_v10 }
 0x21e   :  { %v1228_v16 = vsel %vm1225_vm10, %v1227_v14, %v1223_v63  ;;  %1869 = vrcp.f32 %v1159_v46  ;;  %vm2545_vm13 = vmor %vm1235_vm12, %vm1236_vm11  ;;  %v1254_v32 = vand.u32 2147483647, %v1159_v46  ;;  %v1256_v35 = vand.u32 2147483648, %v1159_v46 }
 0x21f   :  { %v2531_v19 = vmul.f32 %v1228_v16, %v2483_v2  ;;  %v1232_v21 = vsub.f32 1.0, %v1231_v15  ;;  %v1241_v2 = vand.u32 2147483648, %v2510_v53  ;;  %vm1250_vm0 = vweird.f32 %v1159_v46 }
 0x220   :  { %v1083_v52 = vpop.f32.mrf.mxu2  ;;  %v1257_v17 = vor.u32 1.1754944e-38, %v1256_v35  ;;  %vm1255_vm2 = vcmp.eq.f32.partialorder %v1254_v32, 8.507059e+37 }
 0x221   :  { %v1233_v38 = vmul.f32 %v1866_v10, %v1232_v21  ;;  %v2534_v51 = vadd.f32 %v2474_v60, %v1083_v52  ;;  %v1427_v22 = vpack.c.bf16 %v2531_v19, %v2528_v18  ;;  %v1242_v34 = vor.u32 1.1754944e-38, %v1241_v2  ;;  %v1437_v18 = vld [vmem:[%s2744_s10] sm:$0xff] }
 0x222   :  { %v2018_v19 = vmov 0  }
 0x223   :  { %v1868_v55 = vpop.eup %1867  ;;  %v1678_v23 = vmul.f32 -1.442695, %v2534_v51  ;;  %v1234_v7 = vadd.f32 %v1866_v10, %v1233_v38  ;;  %1713 = vset.pattern.permute.xlu0 %v2018_v19 }
 0x224   :  { %v1870_v25 = vpop.eup %1869  ;;  %v2539_v61 = vadd.f32 1.0, %v1868_v55  ;;  %1485 = vperm.xlu0 %1713, %v1437_v18  }
 0x225   :  { %v1246_v49 = vmul.f32 %v1870_v25, %v1159_v46  ;;  %1871 = vpow2.f32 %v1678_v23  ;;  %v1238_v40 = vsel %vm2545_vm13, %v1866_v10, %v1234_v7  ;;  %vm1251_vm14 = vweird.f32 %v1870_v25 }
 0x226   :  { %1873 = vrcp.f32 %v2539_v61  ;;  %v1243_v48 = vsel %vm1240_vm15, %v1242_v34, %v1238_v40  ;;  %vm1252_vm1 = vmor %vm1250_vm0, %vm1251_vm14  ;;  %vm1265_vm4 = vweird.f32 %v2539_v61  ;;  %v1269_v6 = vand.u32 2147483647, %v2539_v61 }
 0x227   :  { %v1247_v29 = vsub.f32 1.0, %v1246_v49  ;;  %v2557_v53 = vmul.f32 %v1243_v48, %v2496_v31 }
 0x228   :  { %v1086_v37 = vpop.f32.mrf.mxu2  ;;  %vm1270_vm7 = vcmp.eq.f32.partialorder %v1269_v6, 8.507059e+37 }
 0x229   :  { %v1248_v41 = vmul.f32 %v1870_v25, %v1247_v29  ;;  %v2552_v42 = vadd.f32 %v2474_v60, %v1086_v37 }
 0x22b   :  { %v1872_v43 = vpop.eup %1871  ;;  %v1249_v26 = vadd.f32 %v1870_v25, %v1248_v41  ;;  %v1679_v44 = vmul.f32 -1.442695, %v2552_v42 }
 0x22c   :  { %v1874_v45 = vpop.eup %1873  ;;  %v1161_v36 = vadd.f32 1.0, %v1872_v43  ;;  %1440 = vperm.xlu0 %1713, %v1435_v33  }
 0x22d   :  { %v1253_v9 = vsel %vm1252_vm1, %v1870_v25, %v1249_v26  ;;  %v1261_v12 = vmul.f32 %v1874_v45, %v2539_v61  ;;  %1875 = vpow2.f32 %v1679_v44  ;;  %vm1266_vm3 = vweird.f32 %v1874_v45 }
 0x22e   :  { %v1258_v39 = vsel %vm1255_vm2, %v1257_v17, %v1253_v9  ;;  %1877 = vrcp.f32 %v1161_v36  ;;  %vm1267_vm5 = vmor %vm1265_vm4, %vm1266_vm3  ;;  %v1286_v11 = vand.u32 2147483648, %v1161_v36  ;;  %v1284_v14 = vand.u32 2147483647, %v1161_v36 }
 0x22f   :  { %v2560_v54 = vmul.f32 %v1258_v39, %v2505_v50  ;;  %v1262_v56 = vsub.f32 1.0, %v1261_v12  ;;  %v1271_v50 = vand.u32 2147483648, %v2539_v61  ;;  %vm1280_vm8 = vweird.f32 %v1161_v36 }
 0x230   :  { %v1088_v57 = vpop.f32.mrf.mxu2  ;;  %v1287_v52 = vor.u32 1.1754944e-38, %v1286_v11  ;;  %vm1285_vm11 = vcmp.eq.f32.partialorder %v1284_v14, 8.507059e+37 }
 0x231   :  { %v1263_v58 = vmul.f32 %v1874_v45, %v1262_v56  ;;  %v2563_v24 = vadd.f32 %v2474_v60, %v1088_v57  ;;  %v1428_v59 = vpack.c.bf16 %v2560_v54, %v2557_v53  ;;  %v1272_v46 = vor.u32 1.1754944e-38, %v1271_v50  ;;  %v1434_v53 = vld [vmem:[%s2741_s7] sm:$0xf]  ;;  %s2019_s7 = smov [#allocation8]  }
 0x232   :  { %s1530_s8 = sshll.u32 %s2019_s7, 4  ;;  %s1531_s8 = int_to_ptr.vmem [resolvable:$true] %s1530_s8 }
 0x233   :  { %v1876_v62 = vpop.eup %1875  ;;  %v1680_v0 = vmul.f32 -1.442695, %v2563_v24  ;;  %v1264_v4 = vadd.f32 %v1874_v45, %v1263_v58 }
 0x234   :  { %v1878_v1 = vpop.eup %1877  ;;  %v1162_v3 = vadd.f32 1.0, %v1876_v62 }
 0x235   :  { %v1276_v31 = vmul.f32 %v1878_v1, %v1161_v36  ;;  %1879 = vpow2.f32 %v1680_v0  ;;  %v1268_v10 = vsel %vm1267_vm5, %v1874_v45, %v1264_v4  ;;  %vm1281_vm6 = vweird.f32 %v1878_v1 }
 0x236   :  { %1881 = vrcp.f32 %v1162_v3  ;;  %v1273_v21 = vsel %vm1270_vm7, %v1272_v46, %v1268_v10  ;;  %vm1282_vm10 = vmor %vm1280_vm8, %vm1281_vm6  ;;  %v1301_v37 = vand.u32 2147483648, %v1162_v3  ;;  %vm1295_vm13 = vweird.f32 %v1162_v3 }
 0x237   :  { %v1277_v27 = vsub.f32 1.0, %v1276_v31  ;;  %v2572_v61 = vmul.f32 %v1273_v21, %v2523_v5  ;;  %v1299_v40 = vand.u32 2147483647, %v1162_v3 }
 0x238   :  { %v1091_v8 = vpop.f32.mrf.mxu2  ;;  %v1302_v44 = vor.u32 1.1754944e-38, %v1301_v37 }
 0x239   :  { %v1278_v13 = vmul.f32 %v1878_v1, %v1277_v27  ;;  %vm1300_vm0 = vcmp.eq.f32.partialorder %v1299_v40, 8.507059e+37  ;;  %v2594_v0 = vadd.f32 %v2474_v60, %v1091_v8 }
 0x23b   :  { %v1880_v63 = vpop.eup %1879  ;;  %v1279_v15 = vadd.f32 %v1878_v1, %v1278_v13 }
 0x23c   :  { %v1882_v16 = vpop.eup %1881  ;;  %v1163_v38 = vadd.f32 1.0, %v1880_v63 }
 0x23d   :  { %v1283_v55 = vsel %vm1282_vm10, %v1878_v1, %v1279_v15  ;;  %v1291_v23 = vmul.f32 %v1882_v16, %v1162_v3  ;;  %vm1296_vm12 = vweird.f32 %v1882_v16  ;;  %v1681_v3 = vmul.f32 -1.442695, %v2594_v0 }
 0x23e   :  { %v1288_v25 = vsel %vm1285_vm11, %v1287_v52, %v1283_v55  ;;  %1883 = vrcp.f32 %v1163_v38  ;;  %vm1297_vm14 = vmor %vm1295_vm13, %vm1296_vm12  ;;  %v1316_v5 = vand.u32 2147483648, %v1163_v38  ;;  %v1314_v26 = vand.u32 2147483647, %v1163_v38 }
 0x23f   :  { %v2575_v7 = vmul.f32 %v1288_v25, %v2534_v51  ;;  %v1292_v49 = vsub.f32 1.0, %v1291_v23  ;;  %vm1310_vm1 = vweird.f32 %v1163_v38 }
 0x240   :  { %v1093_v2 = vpop.f32.mrf.mxu2  ;;  %v1317_v17 = vor.u32 1.1754944e-38, %v1316_v5  ;;  %vm1315_vm3 = vcmp.eq.f32.partialorder %v1314_v26, 8.507059e+37 }
 0x241   :  { %v1293_v28 = vmul.f32 %v1882_v16, %v1292_v49  ;;  %v1429_v29 = vpack.c.bf16 %v2575_v7, %v2572_v61  ;;  %v1447_v61 = vsel %vm595_vm9, %v1426_v20, 0 }
 0x243   :  { %v1294_v32 = vadd.f32 %v1882_v16, %v1293_v28 }
 0x244   :  { %v1884_v30 = vpop.eup %1883 }
 0x245   :  { %v1306_v35 = vmul.f32 %v1884_v30, %v1163_v38  ;;  %v1298_v43 = vsel %vm1297_vm14, %v1882_v16, %v1294_v32  ;;  %vm1311_vm15 = vweird.f32 %v1884_v30 }
 0x246   :  { %v1303_v48 = vsel %vm1300_vm0, %v1302_v44, %v1298_v43  ;;  %vm1312_vm2 = vmor %vm1310_vm1, %vm1311_vm15 }
 0x247   :  { %v1307_v41 = vsub.f32 1.0, %v1306_v35  ;;  %v2580_v12 = vmul.f32 %v1303_v48, %v2552_v42 }
 0x248   :  { %v1096_v34 = vpop.f32.mrf.mxu2 }
 0x249   :  { %v1308_v51 = vmul.f32 %v1884_v30, %v1307_v41  ;;  %v2586_v56 = vadd.f32 %v2474_v60, %v1096_v34 }
 0x24b   :  { %v1309_v45 = vadd.f32 %v1884_v30, %v1308_v51  ;;  %v1683_v1 = vmul.f32 -1.442695, %v2586_v56 }
 0x24d   :  { %v1313_v36 = vsel %vm1312_vm2, %v1884_v30, %v1309_v45 }
 0x24e   :  { %v1318_v9 = vsel %vm1315_vm3, %v1317_v17, %v1313_v36 }
 0x24f   :  { %v2583_v39 = vmul.f32 %v1318_v9, %v2563_v24  ;;  %v2599_v24 = vadd.f32 %v2474_v60, %v1093_v2 }
 0x250   :  { %v1098_v57 = vpop.f32.mrf.mxu2 }
 0x251   :  { %v2589_v58 = vadd.f32 %v2474_v60, %v1098_v57  ;;  %v1430_v62 = vpack.c.bf16 %v2583_v39, %v2580_v12  ;;  %v1682_v4 = vmul.f32 -1.442695, %v2599_v24  ;;  %v1450_v12 = vsel %vm595_vm9, %v1427_v22, 0 }
 0x253   :  { %v1684_v42 = vmul.f32 -1.442695, %v2589_v58 }
 0x255   :  { %1885 = vpow2.f32 %v1684_v42 }
 0x256   :  { %1887 = vpow2.f32 %v1683_v1 }
 0x257   :  { %1889 = vpow2.f32 %v1681_v3 }
 0x258   :  { %v1101_v31 = vpop.f32.mrf.mxu2  ;;  %1891 = vpow2.f32 %v1682_v4 }
 0x259   :  { %v2604_v50 = vadd.f32 %v2474_v60, %v1101_v31 }
 0x25b   :  { %v1685_v6 = vmul.f32 -1.442695, %v2604_v50  ;;  %v1886_v27 = vpop.eup %1885 }
 0x25c   :  { %v1888_v11 = vpop.eup %1887  ;;  %v2607_v8 = vadd.f32 1.0, %v1886_v27 }
 0x25d   :  { %1893 = vpow2.f32 %v1685_v6  ;;  %v2609_v10 = vadd.f32 1.0, %v1888_v11  ;;  %v1890_v14 = vpop.eup %1889 }
 0x25e   :  { %v1892_v63 = vpop.eup %1891  ;;  %1895 = vrcp.f32 %v2607_v8  ;;  %v2616_v21 = vadd.f32 1.0, %v1890_v14  ;;  %vm1370_vm12 = vweird.f32 %v2607_v8  ;;  %v1374_v11 = vand.u32 2147483647, %v2607_v8 }
 0x25f   :  { %1897 = vrcp.f32 %v2609_v10  ;;  %v2619_v38 = vadd.f32 1.0, %v1892_v63  ;;  %vm1355_vm5 = vweird.f32 %v2609_v10 }
 0x260   :  { %v1103_v13 = vpop.f32.mrf.mxu2  ;;  %vm1375_vm3 = vcmp.eq.f32.partialorder %v1374_v11, 8.507059e+37 }
 0x261   :  { %v2612_v46 = vadd.f32 %v2474_v60, %v1103_v13  ;;  %v1376_v13 = vand.u32 2147483648, %v2607_v8 }
 0x263   :  { %v1894_v15 = vpop.eup %1893  ;;  %v1686_v16 = vmul.f32 -1.442695, %v2612_v46 }
 0x264   :  { %v1168_v52 = vadd.f32 1.0, %v1894_v15  ;;  %v2622_v55 = vpop.eup %1895 }
 0x265   :  { %1899 = vpow2.f32 %v1686_v16  ;;  %v2625_v60 = vpop.eup %1897  ;;  %v1366_v49 = vmul.f32 %v2622_v55, %v2607_v8  ;;  %vm1371_vm8 = vweird.f32 %v2622_v55 }
 0x266   :  { %1901 = vrcp.f32 %v1168_v52  ;;  %v1351_v35 = vmul.f32 %v2625_v60, %v2609_v10  ;;  %v1391_v36 = vand.u32 2147483648, %v1168_v52  ;;  %vm1385_vm6 = vweird.f32 %v1168_v52  ;;  %vm2655_vm13 = vmor %vm1370_vm12, %vm1371_vm8 }
 0x267   :  { %1903 = vrcp.f32 %v2616_v21  ;;  %v1367_v40 = vsub.f32 1.0, %v1366_v49  ;;  %v1389_v57 = vand.u32 2147483647, %v1168_v52  ;;  %vm1356_vm7 = vweird.f32 %v2625_v60 }
 0x268   :  { %1905 = vrcp.f32 %v2619_v38  ;;  %v1352_v43 = vsub.f32 1.0, %v1351_v35  ;;  %v1392_v14 = vor.u32 1.1754944e-38, %v1391_v36  ;;  %vm2670_vm2 = vmor %vm1355_vm5, %vm1356_vm7  ;;  %vm1340_vm7 = vweird.f32 %v2619_v38 }
 0x269   :  { %v1368_v26 = vmul.f32 %v2622_v55, %v1367_v40  ;;  %vm1390_vm14 = vcmp.eq.f32.partialorder %v1389_v57, 8.507059e+37  ;;  %v1377_v40 = vor.u32 1.1754944e-38, %v1376_v13  ;;  %v1329_v36 = vand.u32 2147483647, %v2616_v21 }
 0x26a   :  { %v1353_v9 = vmul.f32 %v2625_v60, %v1352_v43 }
 0x26b   :  { %v1900_v23 = vpop.eup %1899  ;;  %v1369_v42 = vadd.f32 %v2622_v55, %v1368_v26 }
 0x26c   :  { %v1902_v25 = vpop.eup %1901  ;;  %v1169_v2 = vadd.f32 1.0, %v1900_v23  ;;  %v1354_v63 = vadd.f32 %v2625_v60, %v1353_v9  ;;  %v1361_v23 = vand.u32 2147483648, %v2609_v10 }
 0x26d   :  { %v1381_v28 = vmul.f32 %v1902_v25, %v1168_v52  ;;  %v2629_v30 = vpop.eup %1903  ;;  %vm1386_vm4 = vweird.f32 %v1902_v25  ;;  %v1359_v52 = vand.u32 2147483647, %v2609_v10  ;;  %v1373_v8 = vsel %vm2655_vm13, %v2622_v55, %v1369_v42 }
 0x26e   :  { %1907 = vrcp.f32 %v1169_v2  ;;  %v2631_v32 = vpop.eup %1905  ;;  %v1321_v5 = vmul.f32 %v2629_v30, %v2616_v21  ;;  %vm2645_vm10 = vmor %vm1385_vm6, %vm1386_vm4  ;;  %v1406_v4 = vand.u32 2147483648, %v1169_v2  ;;  %v1404_v27 = vand.u32 2147483647, %v1169_v2 }
 0x26f   :  { %v1382_v37 = vsub.f32 1.0, %v1381_v28  ;;  %v1336_v34 = vmul.f32 %v2631_v32, %v2619_v38  ;;  %vm1400_vm15 = vweird.f32 %v1169_v2  ;;  %v1362_v43 = vor.u32 1.1754944e-38, %v1361_v23 }
 0x270   :  { %v1322_v48 = vsub.f32 1.0, %v1321_v5  ;;  %v1407_v49 = vor.u32 1.1754944e-38, %v1406_v4  ;;  %vm1405_vm1 = vcmp.eq.f32.partialorder %v1404_v27, 8.507059e+37  ;;  %v1358_v5 = vsel %vm2670_vm2, %v2625_v60, %v1354_v63 }
 0x271   :  { %v1383_v41 = vmul.f32 %v1902_v25, %v1382_v37  ;;  %v1337_v17 = vsub.f32 1.0, %v1336_v34  ;;  %vm1341_vm4 = vweird.f32 %v2631_v32  ;;  %vm1360_vm5 = vcmp.eq.f32.partialorder %v1359_v52, 8.507059e+37 }
 0x272   :  { %v1323_v37 = vmul.f32 %v2629_v30, %v1322_v48  ;;  %vm1326_vm6 = vweird.f32 %v2629_v30  ;;  %v1363_v60 = vsel %vm1360_vm5, %v1362_v43, %v1358_v5  ;;  %vm1342_vm8 = vmor %vm1340_vm7, %vm1341_vm4  ;;  %vm1330_vm13 = vcmp.eq.f32.partialorder %v1329_v36, 8.507059e+37 }
 0x273   :  { %v1384_v44 = vadd.f32 %v1902_v25, %v1383_v41  ;;  %v1338_v28 = vmul.f32 %v2631_v32, %v1337_v17  ;;  %v1331_v17 = vand.u32 2147483648, %v2616_v21  ;;  %v1422_v57 = vmul.f32 %v1363_v60, %v2586_v56 }
 0x274   :  { %v1908_v51 = vpop.eup %1907 }
 0x275   :  { %v1396_v45 = vmul.f32 %v1908_v51, %v1169_v2  ;;  %v1388_v31 = vsel %vm2645_vm10, %v1902_v25, %v1384_v44  ;;  %vm1401_vm11 = vweird.f32 %v1908_v51  ;;  %v1339_v26 = vadd.f32 %v2631_v32, %v1338_v28 }
 0x276   :  { %v1393_v25 = vsel %vm1390_vm14, %v1392_v14, %v1388_v31  ;;  %vm1402_vm0 = vmor %vm1400_vm15, %vm1401_vm11  ;;  %v1346_v44 = vand.u32 2147483648, %v2619_v38  ;;  %vm1325_vm10 = vweird.f32 %v2616_v21  ;;  %v1332_v42 = vor.u32 1.1754944e-38, %v1331_v17 }
 0x277   :  { %v1397_v1 = vsub.f32 1.0, %v1396_v45  ;;  %v1424_v55 = vmul.f32 %v1393_v25, %v2604_v50  ;;  %v1324_v45 = vadd.f32 %v2629_v30, %v1323_v37  ;;  %v1344_v50 = vand.u32 2147483647, %v2619_v38  ;;  %vm1327_vm11 = vmor %vm1325_vm10, %vm1326_vm6 }
 0x278   :  { %v1343_v9 = vsel %vm1342_vm8, %v2631_v32, %v1339_v26  ;;  %v1347_v38 = vor.u32 1.1754944e-38, %v1346_v44 }
 0x279   :  { %v1398_v6 = vmul.f32 %v1908_v51, %v1397_v1  ;;  %vm1345_vm12 = vcmp.eq.f32.partialorder %v1344_v50, 8.507059e+37 }
 0x27a   :  { %v1348_v3 = vsel %vm1345_vm12, %v1347_v38, %v1343_v9 }
 0x27b   :  { %v1399_v16 = vadd.f32 %v1908_v51, %v1398_v6  ;;  %v1421_v31 = vmul.f32 %v1348_v3, %v2599_v24  ;;  %v1456_v24 = vsel %vm595_vm9, %v1429_v29, 0 }
 0x27d   :  { %v1403_v35 = vsel %vm1402_vm0, %v1908_v51, %v1399_v16  ;;  %v1378_v51 = vsel %vm1375_vm3, %v1377_v40, %v1373_v8 }
 0x27e   :  { %v1408_v41 = vsel %vm1405_vm1, %v1407_v49, %v1403_v35 }
 0x27f   :  { %v1425_v34 = vmul.f32 %v1408_v41, %v2612_v46  ;;  %v1423_v46 = vmul.f32 %v1378_v51, %v2589_v58  ;;  %v1328_v58 = vsel %vm1327_vm11, %v2629_v30, %v1324_v45  ;;  %v1459_v30 = vsel %vm595_vm9, %v1430_v62, 0 }
 0x280   :  { %v1333_v4 = vsel %vm1330_vm13, %v1332_v42, %v1328_v58 }
 0x281   :  { %v1433_v10 = vpack.c.bf16 %v1425_v34, %v1424_v55  ;;  %v1432_v1 = vpack.c.bf16 %v1423_v46, %v1422_v57  ;;  %v1420_v32 = vmul.f32 %v1333_v4, %v2594_v0  ;;  %v1453_v0 = vsel %vm595_vm9, %v1428_v59, 0 }
 0x283   :  { %v1468_v48 = vsel %vm595_vm9, %v1433_v10, 0  ;;  %v1465_v21 = vsel %vm595_vm9, %v1432_v1, 0  ;;  %v1431_v56 = vpack.c.bf16 %v1421_v31, %v1420_v32 }
 0x284   :  { %1470 = vmatpush.bf16.xpose.msra.mxu3 %v1468_v48 }
 0x285   :  { %v1462_v6 = vsel %vm595_vm9, %v1431_v56, 0 }
 0x28c   :  { %1471 = vmatpush.bf16.xpose.msra.mxu3 %v1465_v21 }
 0x294   :  { %1472 = vmatpush.bf16.xpose.msra.mxu3 %v1462_v6 }
 0x296   :  { %v1486_v54 = vpop.permute.xlu0 %1485 }
 0x29c   :  { %1473 = vmatpush.bf16.xpose.msra.mxu3 %v1459_v30 }
 0x29e   :  { %v1441_v52 = vpop.permute.xlu0 %1440 }
 0x2a4   :  { %1474 = vmatpush.bf16.xpose.msra.mxu3 %v1456_v24 }
 0x2ac   :  { %1475 = vmatpush.bf16.xpose.msra.mxu3 %v1453_v0 }
 0x2b4   :  { %1476 = vmatpush.bf16.xpose.msra.mxu3 %v1450_v12 }
 0x2bc   :  { %1477 = vmatpush.bf16.xpose.msra.mxu3 %v1447_v61 }
 0x2c3   :  { %1687 = vmatmul.msk.bf16.vlgmr.msra.gmra.mxu3 %vm595_vm9, %v1434_v53 }
 0x2c4   :  { %1491 = vmatpush.bf16.xpose.msrb.mxu3 %v1468_v48 }
 0x2cc   :  { %1492 = vmatpush.bf16.xpose.msrb.mxu3 %v1465_v21 }
 0x2d4   :  { %1493 = vmatpush.bf16.xpose.msrb.mxu3 %v1462_v6 }
 0x2dc   :  { %1494 = vmatpush.bf16.xpose.msrb.mxu3 %v1459_v30 }
 0x2e4   :  { %1495 = vmatpush.bf16.xpose.msrb.mxu3 %v1456_v24 }
 0x2ec   :  { %1496 = vmatpush.bf16.xpose.msrb.mxu3 %v1453_v0 }
 0x2f4   :  { %1497 = vmatpush.bf16.xpose.msrb.mxu3 %v1450_v12 }
 0x2fc   :  { %1498 = vmatpush.bf16.xpose.msrb.mxu3 %v1447_v61 }
 0x303   :  { %1688 = vmatmul.msk.bf16.vlgmr.msrb.gmra.mxu3 %vm595_vm9, %v1436_v47 }
 0x346   :  { %v1479_v20 = vpop.f32.mrf.mxu3 }
 0x347   :  { %v1480_v49 = vadd.f32 %v1479_v20, %v1441_v52 }
 0x34e   :  { %v1481_v22 = vpop.f32.mrf.mxu3 }
 0x386   :  { %v1500_v59 = vpop.f32.mrf.mxu3 }
 0x387   :  { %v1501_v7 = vadd.f32 %v1500_v59, %v1486_v54 }
 0x389   :  { %v1689_v29 = vmul.f32 -1.442695, %v1501_v7 }
 0x38b   :  { %1909 = vpow2.f32 %v1689_v29 }
 0x38e   :  { %v1502_v39 = vpop.f32.mrf.mxu3 }
 0x391   :  { %v1910_v62 = vpop.eup %1909 }
 0x392   :  { %v1507_v27 = vadd.f32 1.0, %v1910_v62 }
 0x394   :  { %1911 = vrcp.f32 %v1507_v27  ;;  %v1519_v63 = vand.u32 2147483648, %v1507_v27  ;;  %v1517_v16 = vand.u32 2147483647, %v1507_v27  ;;  %vm1513_vm9 = vweird.f32 %v1507_v27 }
 0x396   :  { %v1520_v25 = vor.u32 1.1754944e-38, %v1519_v63  ;;  %vm1518_vm0 = vcmp.eq.f32.partialorder %v1517_v16, 8.507059e+37 }
 0x39a   :  { %v1912_v11 = vpop.eup %1911 }
 0x39b   :  { %v1509_v13 = vmul.f32 %v1912_v11, %v1507_v27  ;;  %vm1514_vm14 = vweird.f32 %v1912_v11 }
 0x39c   :  { %vm1515_vm15 = vmor %vm1513_vm9, %vm1514_vm14 }
 0x39d   :  { %v1510_v14 = vsub.f32 1.0, %v1509_v13 }
 0x39f   :  { %v1511_v15 = vmul.f32 %v1912_v11, %v1510_v14 }
 0x3a1   :  { %v1512_v23 = vadd.f32 %v1912_v11, %v1511_v15 }
 0x3a3   :  { %v1516_v28 = vsel %vm1515_vm15, %v1912_v11, %v1512_v23 }
 0x3a4   :  { %v1521_v8 = vsel %vm1518_vm0, %v1520_v25, %v1516_v28 }
 0x3a5   :  { %v1523_v35 = vmul.f32 %v1521_v8, %v1480_v49 }
 0x3a7   :  { %1524 = vst [vmem:[#allocation8] sm:$0xff] %v1523_v35 }
 0x3a8   :  { %1535 = dma.vmem_to_hbm [thread:$0]  %s1531_s8, 128, %s1533_s27, [#allocation4]  }
 0x3a9   :  { %2013 = dma.done.wait [#allocation4], 128  }
 0x3aa   :  { %2014 = vsyncadd [#allocation4], 4294967168 }
 0x3ab   :  { %1540 = vsyncpa [#allocation3], 1 }
 0x3ac   :  { %1541 = vsyncpa [#allocation6], 1 }
 0x3ad   :  { %1542 = vsyncpa [#allocation4], 1 }

</bundles_post_ra>
